<compile_context>
chip_gen: v5e
topology: v5e:2x2
jax: 0.10.0
libtpu: 0.0.40
codegen_flags: <defaults>
</compile_context>

<pallas_src>
import functools

import jax
import jax.numpy as jnp
from jax.experimental import pallas as pl
from jax.experimental.pallas import tpu as pltpu


DIM_IN = 29
DIM_AUD = 64
WIN_SIZE = 16
_NEG_SLOPE = 0.02
_CONV_CH = [(DIM_IN, 32), (32, 32), (32, 64), (64, 64)]  # (cin, cout) per conv

# dtype of the MXU operands only (accumulation + all elementwise math stay
# f32).  Set to jnp.bfloat16 on v6e / v7x for peak MXU throughput.
MATMUL_DTYPE = jnp.float32

# ---- single weight/bias slab layout -----------------------------------------
# Each entry occupies `cout` rows; columns [0:K] hold the K-folded weight
# (K = 3*Cin for convs, K = in_features for the linears) and column K holds
# the bias.  Row offsets are multiples of 8 (sublane aligned).
_SLAB_ROWS = 320
_SLAB_COLS = 256                  # >= max(K) + 1 = 193, lane-padded
_SLAB_LAYOUT = [                  # (row_offset, cout, K)
    (0,   32, 3 * DIM_IN),        # conv1
    (32,  32, 3 * 32),            # conv2
    (64,  64, 3 * 32),            # conv3
    (128, 64, 3 * 64),            # conv4
    (192, 64, 64),                # fc1
    (256, DIM_AUD, 64),           # fc2
]


# ------------------------------------------------------------------------------
# Fused whole-network kernel
# ------------------------------------------------------------------------------
def _audionet_kernel(x_ref, w_ref, o_ref, *, t0):
    """x_ref: (T, Cin, TB) f32   w_ref: (320, 256) f32   o_ref: (dim_aud, TB)."""

    def lrelu(v):                                  # f32 elementwise (VPU)
        return jnp.where(v > 0, v, _NEG_SLOPE * v)

    def wslice(idx):
        r0, cout, k = _SLAB_LAYOUT[idx]
        w = w_ref[r0:r0 + cout, 0:k]               # (Cout, K)
        b = w_ref[r0:r0 + cout, k:k + 1]           # (Cout, 1)
        return w, b

    def mm(w, x):                                  # one MXU matmul, f32 acc
        return jnp.dot(w.astype(MATMUL_DTYPE), x.astype(MATMUL_DTYPE),
                       preferred_element_type=jnp.float32)

    tb = x_ref.shape[2]
    # Center window (folded into the kernel): 16 timesteps, each (Cin, TB).
    xs = [x_ref[t0 + t] for t in range(WIN_SIZE)]

    def conv_k3s2p1(xs, layer_idx):
        # torch Conv1d(k=3, s=2, p=1):  y[t] = W @ [x[2t-1]; x[2t]; x[2t+1]]
        # Taps are folded into K and all output timesteps stacked along lanes
        # -> a single (Cout, 3*Cin) x (3*Cin, L_out*TB) matmul per layer.
        w, b = wslice(layer_idx)
        zero = jnp.zeros_like(xs[0])
        cols = []
        for t in range(len(xs) // 2):
            left = zero if t == 0 else xs[2 * t - 1]          # zero pad @ t==0
            cols.append(jnp.concatenate([left, xs[2 * t], xs[2 * t + 1]],
                                        axis=0))              # (3*Cin, TB)
        patch = jnp.concatenate(cols, axis=1)                 # (3*Cin, L_out*TB)
        y = lrelu(mm(w, patch) + b)                           # (Cout, L_out*TB)
        return [y[:, t * tb:(t + 1) * tb] for t in range(len(xs) // 2)]

    xs = conv_k3s2p1(xs, 0)      # L 16 -> 8,  C 29 -> 32
    xs = conv_k3s2p1(xs, 1)      # L  8 -> 4,  C 32 -> 32
    xs = conv_k3s2p1(xs, 2)      # L  4 -> 2,  C 32 -> 64
    xs = conv_k3s2p1(xs, 3)      # L  2 -> 1,  C 64 -> 64
    h = xs[0]                    # (64, TB)   == squeeze(-1)

    w1, b1 = wslice(4)
    h = lrelu(mm(w1, h) + b1)                                 # Linear(64, 64)
    w2, b2 = wslice(5)
    o_ref[...] = (mm(w2, h) + b2).astype(o_ref.dtype)         # Linear(64, dim_aud)


@jax.jit
def audionet_forward(x, slab):
    """x: (B, dim_in, T) torch NCW layout.  Returns (B, dim_aud)."""
    B, cin, T = x.shape
    t0 = 8 - WIN_SIZE // 2

    # Batch-in-lanes layout (T, Cin, B).  Pure layout plumbing; the center
    # window slice itself happens inside the kernel.
    xk = jnp.transpose(x, (2, 1, 0)).astype(jnp.float32)

    TB = 128 if B <= 128 else 256                 # lane-dense batch tile
    B_pad = -(-B // TB) * TB
    if B_pad != B:
        xk = jnp.pad(xk, ((0, 0), (0, 0), (0, B_pad - B)))

    out = pl.pallas_call(
        functools.partial(_audionet_kernel, t0=t0),
        out_shape=jax.ShapeDtypeStruct((DIM_AUD, B_pad), jnp.float32),
        grid=(B_pad // TB,),
        in_specs=[
            pl.BlockSpec((T, cin, TB), lambda i: (0, 0, i)),
            # constant index_map -> weight slab DMA'd once, stays VMEM-resident
            pl.BlockSpec((_SLAB_ROWS, _SLAB_COLS), lambda i: (0, 0)),
        ],
        out_specs=pl.BlockSpec((DIM_AUD, TB), lambda i: (0, i)),
        compiler_params=pltpu.CompilerParams(
            dimension_semantics=("parallel",)),   # engages both TCs on v7x
    )(xk, slab)
    return out[:, :B].T                           # (B, dim_aud)


# ------------------------------------------------------------------------------
# Deterministic synthetic parameters (torch layout) + slab packing
# ------------------------------------------------------------------------------
def init_torch_params(key):
    params = {"conv": []}
    for (cin, cout) in _CONV_CH:
        key, kw, kb = jax.random.split(key, 3)
        fan_in = cin * 3
        w = jax.random.normal(kw, (cout, cin, 3), jnp.float32) / jnp.sqrt(
            jnp.float32(fan_in))
        b = 0.1 * jax.random.normal(kb, (cout,), jnp.float32)
        params["conv"].append((w, b))
    key, kw1, kb1, kw2, kb2 = jax.random.split(key, 5)
    params["fc1"] = (jax.random.normal(kw1, (64, 64), jnp.float32) / 8.0,
                     0.1 * jax.random.normal(kb1, (64,), jnp.float32))
    params["fc2"] = (jax.random.normal(kw2, (DIM_AUD, 64), jnp.float32) / 8.0,
                     0.1 * jax.random.normal(kb2, (DIM_AUD,), jnp.float32))
    return params


def pack_params(tp):
    """Pack all weights + biases into one (320, 256) f32 slab (one DMA).

    Conv weights (Cout, Cin, 3) are K-folded tap-major to (Cout, 3*Cin); the
    linears keep torch (out, in) layout (kernel computes y = W @ x).  The
    bias sits in column K of each block.
    """
    slab = jnp.zeros((_SLAB_ROWS, _SLAB_COLS), jnp.float32)

    def put(slab, entry, w2d, b):
        r0, cout, k = entry
        slab = slab.at[r0:r0 + cout, 0:k].set(w2d)
        slab = slab.at[r0:r0 + cout, k].set(b)
        return slab

    for entry, (w, b) in zip(_SLAB_LAYOUT[:4], tp["conv"]):
        cout = w.shape[0]
        w2d = jnp.transpose(w, (0, 2, 1)).reshape(cout, -1)   # (Cout, 3*Cin)
        slab = put(slab, entry, w2d, b)
    for entry, name in zip(_SLAB_LAYOUT[4:], ("fc1", "fc2")):
        w, b = tp[name]
        slab = put(slab, entry, w, b)
    return slab


# ------------------------------------------------------------------------------
# Pure-JAX reference (torch semantics) for the correctness self-check
# ------------------------------------------------------------------------------
def _ref_conv1d_k3s2p1(x, w, b):
    # x: (B, Cin, L), w: (Cout, Cin, 3) torch layout
    L = x.shape[2]
    xp = jnp.pad(x, ((0, 0), (0, 0), (1, 1)))
    ys = []
    for t in range(L // 2):
        window = xp[:, :, 2 * t:2 * t + 3]                    # (B, Cin, 3)
        ys.append(jnp.einsum("bck,ock->bo", window, w) + b)
    return jnp.stack(ys, axis=-1)                             # (B, Cout, L//2)


def _reference_forward(x, tp):
    half_w = WIN_SIZE // 2
    h = x[:, :, 8 - half_w:8 + half_w]
    for (w, b) in tp["conv"]:
        h = _ref_conv1d_k3s2p1(h, w, b)
        h = jnp.where(h > 0, h, _NEG_SLOPE * h)
    h = h[:, :, 0]                                            # squeeze(-1)
    w1, b1 = tp["fc1"]
    h = h @ w1.T + b1
    h = jnp.where(h > 0, h, _NEG_SLOPE * h)
    w2, b2 = tp["fc2"]
    return h @ w2.T + b2


if __name__ == "__main__":
    key = jax.random.PRNGKey(0)
    kx, kp = jax.random.split(key)
    B, T = 2, 16
    x = jax.random.normal(kx, (B, DIM_IN, T), jnp.float32)

    tparams = init_torch_params(kp)
    slab = pack_params(tparams)

    out = audionet_forward(x, slab)
    out = jax.block_until_ready(out)
    assert out.shape == (B, DIM_AUD), out.shape
    assert bool(jnp.all(jnp.isfinite(out)))

    ref = _reference_forward(x, tparams)
    tol = 1e-4 if MATMUL_DTYPE == jnp.float32 else 5e-2
    err = float(jnp.max(jnp.abs(out - ref)))
    assert err < tol, f"max abs err {err}"
    print("KERNEL_OK")
</pallas_src>

<mosaic_0001>
module attributes {stable_mosaic.version = 11 : i64} {
  func.func @_audionet_kernel(%arg0: i32, %arg1: memref<16x29x128xf32, #tpu.memory_space<vmem>>, %arg2: memref<320x256xf32, #tpu.memory_space<vmem>>, %arg3: memref<64x128xf32, #tpu.memory_space<vmem>>) attributes {dimension_semantics = [#tpu.dimension_semantics<parallel>], iteration_bounds = array<i64: 1>, scalar_prefetch = 0 : i64, scratch_operands = 0 : i64, tpu.core_type = #tpu.core_type<tc>, window_params = [{transform_indices = @transform_0, window_bounds = array<i64: 16, 29, 128>}, {pipeline_mode = #tpu.pipeline_mode<synchronous>, transform_indices = @transform_1, window_bounds = array<i64: 320, 256>}, {transform_indices = @transform_2, window_bounds = array<i64: 64, 128>}]} {
    %c0 = arith.constant 0 : index
    %c0_0 = arith.constant 0 : index
    %c0_1 = arith.constant 0 : index
    %0 = vector.load %arg1[%c0, %c0_0, %c0_1] : memref<16x29x128xf32, #tpu.memory_space<vmem>>, vector<1x29x128xf32>
    %1 = vector.shape_cast %0 : vector<1x29x128xf32> to vector<29x128xf32>
    %c1 = arith.constant 1 : index
    %c0_2 = arith.constant 0 : index
    %c0_3 = arith.constant 0 : index
    %2 = vector.load %arg1[%c1, %c0_2, %c0_3] : memref<16x29x128xf32, #tpu.memory_space<vmem>>, vector<1x29x128xf32>
    %3 = vector.shape_cast %2 : vector<1x29x128xf32> to vector<29x128xf32>
    %c2 = arith.constant 2 : index
    %c0_4 = arith.constant 0 : index
    %c0_5 = arith.constant 0 : index
    %4 = vector.load %arg1[%c2, %c0_4, %c0_5] : memref<16x29x128xf32, #tpu.memory_space<vmem>>, vector<1x29x128xf32>
    %5 = vector.shape_cast %4 : vector<1x29x128xf32> to vector<29x128xf32>
    %c3 = arith.constant 3 : index
    %c0_6 = arith.constant 0 : index
    %c0_7 = arith.constant 0 : index
    %6 = vector.load %arg1[%c3, %c0_6, %c0_7] : memref<16x29x128xf32, #tpu.memory_space<vmem>>, vector<1x29x128xf32>
    %7 = vector.shape_cast %6 : vector<1x29x128xf32> to vector<29x128xf32>
    %c4 = arith.constant 4 : index
    %c0_8 = arith.constant 0 : index
    %c0_9 = arith.constant 0 : index
    %8 = vector.load %arg1[%c4, %c0_8, %c0_9] : memref<16x29x128xf32, #tpu.memory_space<vmem>>, vector<1x29x128xf32>
    %9 = vector.shape_cast %8 : vector<1x29x128xf32> to vector<29x128xf32>
    %c5 = arith.constant 5 : index
    %c0_10 = arith.constant 0 : index
    %c0_11 = arith.constant 0 : index
    %10 = vector.load %arg1[%c5, %c0_10, %c0_11] : memref<16x29x128xf32, #tpu.memory_space<vmem>>, vector<1x29x128xf32>
    %11 = vector.shape_cast %10 : vector<1x29x128xf32> to vector<29x128xf32>
    %c6 = arith.constant 6 : index
    %c0_12 = arith.constant 0 : index
    %c0_13 = arith.constant 0 : index
    %12 = vector.load %arg1[%c6, %c0_12, %c0_13] : memref<16x29x128xf32, #tpu.memory_space<vmem>>, vector<1x29x128xf32>
    %13 = vector.shape_cast %12 : vector<1x29x128xf32> to vector<29x128xf32>
    %c7 = arith.constant 7 : index
    %c0_14 = arith.constant 0 : index
    %c0_15 = arith.constant 0 : index
    %14 = vector.load %arg1[%c7, %c0_14, %c0_15] : memref<16x29x128xf32, #tpu.memory_space<vmem>>, vector<1x29x128xf32>
    %15 = vector.shape_cast %14 : vector<1x29x128xf32> to vector<29x128xf32>
    %c8 = arith.constant 8 : index
    %c0_16 = arith.constant 0 : index
    %c0_17 = arith.constant 0 : index
    %16 = vector.load %arg1[%c8, %c0_16, %c0_17] : memref<16x29x128xf32, #tpu.memory_space<vmem>>, vector<1x29x128xf32>
    %17 = vector.shape_cast %16 : vector<1x29x128xf32> to vector<29x128xf32>
    %c9 = arith.constant 9 : index
    %c0_18 = arith.constant 0 : index
    %c0_19 = arith.constant 0 : index
    %18 = vector.load %arg1[%c9, %c0_18, %c0_19] : memref<16x29x128xf32, #tpu.memory_space<vmem>>, vector<1x29x128xf32>
    %19 = vector.shape_cast %18 : vector<1x29x128xf32> to vector<29x128xf32>
    %c10 = arith.constant 10 : index
    %c0_20 = arith.constant 0 : index
    %c0_21 = arith.constant 0 : index
    %20 = vector.load %arg1[%c10, %c0_20, %c0_21] : memref<16x29x128xf32, #tpu.memory_space<vmem>>, vector<1x29x128xf32>
    %21 = vector.shape_cast %20 : vector<1x29x128xf32> to vector<29x128xf32>
    %c11 = arith.constant 11 : index
    %c0_22 = arith.constant 0 : index
    %c0_23 = arith.constant 0 : index
    %22 = vector.load %arg1[%c11, %c0_22, %c0_23] : memref<16x29x128xf32, #tpu.memory_space<vmem>>, vector<1x29x128xf32>
    %23 = vector.shape_cast %22 : vector<1x29x128xf32> to vector<29x128xf32>
    %c12 = arith.constant 12 : index
    %c0_24 = arith.constant 0 : index
    %c0_25 = arith.constant 0 : index
    %24 = vector.load %arg1[%c12, %c0_24, %c0_25] : memref<16x29x128xf32, #tpu.memory_space<vmem>>, vector<1x29x128xf32>
    %25 = vector.shape_cast %24 : vector<1x29x128xf32> to vector<29x128xf32>
    %c13 = arith.constant 13 : index
    %c0_26 = arith.constant 0 : index
    %c0_27 = arith.constant 0 : index
    %26 = vector.load %arg1[%c13, %c0_26, %c0_27] : memref<16x29x128xf32, #tpu.memory_space<vmem>>, vector<1x29x128xf32>
    %27 = vector.shape_cast %26 : vector<1x29x128xf32> to vector<29x128xf32>
    %c14 = arith.constant 14 : index
    %c0_28 = arith.constant 0 : index
    %c0_29 = arith.constant 0 : index
    %28 = vector.load %arg1[%c14, %c0_28, %c0_29] : memref<16x29x128xf32, #tpu.memory_space<vmem>>, vector<1x29x128xf32>
    %29 = vector.shape_cast %28 : vector<1x29x128xf32> to vector<29x128xf32>
    %c15 = arith.constant 15 : index
    %c0_30 = arith.constant 0 : index
    %c0_31 = arith.constant 0 : index
    %30 = vector.load %arg1[%c15, %c0_30, %c0_31] : memref<16x29x128xf32, #tpu.memory_space<vmem>>, vector<1x29x128xf32>
    %31 = vector.shape_cast %30 : vector<1x29x128xf32> to vector<29x128xf32>
    %c0_32 = arith.constant 0 : index
    %c0_33 = arith.constant 0 : index
    %32 = vector.load %arg2[%c0_32, %c0_33] : memref<320x256xf32, #tpu.memory_space<vmem>>, vector<32x87xf32>
    %c0_34 = arith.constant 0 : index
    %c87 = arith.constant 87 : index
    %33 = vector.load %arg2[%c0_34, %c87] : memref<320x256xf32, #tpu.memory_space<vmem>>, vector<32x1xf32>
    %cst = arith.constant 0.000000e+00 : f32
    %34 = vector.broadcast %cst : f32 to vector<29x128xf32>
    %35 = tpu.concatenate %34, %1, %3 in 0 : vector<29x128xf32>, vector<29x128xf32>, vector<29x128xf32> -> vector<87x128xf32>
    %36 = tpu.concatenate %3, %5, %7 in 0 : vector<29x128xf32>, vector<29x128xf32>, vector<29x128xf32> -> vector<87x128xf32>
    %37 = tpu.concatenate %7, %9, %11 in 0 : vector<29x128xf32>, vector<29x128xf32>, vector<29x128xf32> -> vector<87x128xf32>
    %38 = tpu.concatenate %11, %13, %15 in 0 : vector<29x128xf32>, vector<29x128xf32>, vector<29x128xf32> -> vector<87x128xf32>
    %39 = tpu.concatenate %15, %17, %19 in 0 : vector<29x128xf32>, vector<29x128xf32>, vector<29x128xf32> -> vector<87x128xf32>
    %40 = tpu.concatenate %19, %21, %23 in 0 : vector<29x128xf32>, vector<29x128xf32>, vector<29x128xf32> -> vector<87x128xf32>
    %41 = tpu.concatenate %23, %25, %27 in 0 : vector<29x128xf32>, vector<29x128xf32>, vector<29x128xf32> -> vector<87x128xf32>
    %42 = tpu.concatenate %27, %29, %31 in 0 : vector<29x128xf32>, vector<29x128xf32>, vector<29x128xf32> -> vector<87x128xf32>
    %43 = tpu.concatenate %35, %36, %37, %38, %39, %40, %41, %42 in 1 : vector<87x128xf32>, vector<87x128xf32>, vector<87x128xf32>, vector<87x128xf32>, vector<87x128xf32>, vector<87x128xf32>, vector<87x128xf32>, vector<87x128xf32> -> vector<87x1024xf32>
    %cst_35 = arith.constant dense<0.000000e+00> : vector<32x1024xf32>
    %44 = tpu.matmul %32, %43, %cst_35 {dimension_numbers = #tpu.dot_dimension_numbers<[1], [0], [0], [1], [0, 0, 1, 1], [], []>} : vector<32x87xf32>, vector<87x1024xf32>, vector<32x1024xf32> -> vector<32x1024xf32>
    %45 = vector.broadcast %33 : vector<32x1xf32> to vector<32x1024xf32>
    %46 = arith.addf %44, %45 : vector<32x1024xf32>
    %cst_36 = arith.constant 0.000000e+00 : f32
    %47 = vector.broadcast %cst_36 : f32 to vector<32x1024xf32>
    %48 = arith.cmpf ogt, %46, %47 : vector<32x1024xf32>
    %cst_37 = arith.constant 2.000000e-02 : f32
    %49 = vector.broadcast %cst_37 : f32 to vector<32x1024xf32>
    %50 = arith.mulf %49, %46 : vector<32x1024xf32>
    %51 = arith.select %48, %46, %50 : vector<32x1024xi1>, vector<32x1024xf32>
    %52 = vector.extract_strided_slice %51 {offsets = [0, 0], sizes = [32, 128], strides = [1, 1]} : vector<32x1024xf32> to vector<32x128xf32>
    %53 = vector.extract_strided_slice %51 {offsets = [0, 128], sizes = [32, 128], strides = [1, 1]} : vector<32x1024xf32> to vector<32x128xf32>
    %54 = vector.extract_strided_slice %51 {offsets = [0, 256], sizes = [32, 128], strides = [1, 1]} : vector<32x1024xf32> to vector<32x128xf32>
    %55 = vector.extract_strided_slice %51 {offsets = [0, 384], sizes = [32, 128], strides = [1, 1]} : vector<32x1024xf32> to vector<32x128xf32>
    %56 = vector.extract_strided_slice %51 {offsets = [0, 512], sizes = [32, 128], strides = [1, 1]} : vector<32x1024xf32> to vector<32x128xf32>
    %57 = vector.extract_strided_slice %51 {offsets = [0, 640], sizes = [32, 128], strides = [1, 1]} : vector<32x1024xf32> to vector<32x128xf32>
    %58 = vector.extract_strided_slice %51 {offsets = [0, 768], sizes = [32, 128], strides = [1, 1]} : vector<32x1024xf32> to vector<32x128xf32>
    %59 = vector.extract_strided_slice %51 {offsets = [0, 896], sizes = [32, 128], strides = [1, 1]} : vector<32x1024xf32> to vector<32x128xf32>
    %c32 = arith.constant 32 : index
    %c0_38 = arith.constant 0 : index
    %60 = vector.load %arg2[%c32, %c0_38] : memref<320x256xf32, #tpu.memory_space<vmem>>, vector<32x96xf32>
    %c32_39 = arith.constant 32 : index
    %c96 = arith.constant 96 : index
    %61 = vector.load %arg2[%c32_39, %c96] : memref<320x256xf32, #tpu.memory_space<vmem>>, vector<32x1xf32>
    %cst_40 = arith.constant 0.000000e+00 : f32
    %62 = vector.broadcast %cst_40 : f32 to vector<32x128xf32>
    %63 = tpu.concatenate %62, %52, %53 in 0 : vector<32x128xf32>, vector<32x128xf32>, vector<32x128xf32> -> vector<96x128xf32>
    %64 = tpu.concatenate %53, %54, %55 in 0 : vector<32x128xf32>, vector<32x128xf32>, vector<32x128xf32> -> vector<96x128xf32>
    %65 = tpu.concatenate %55, %56, %57 in 0 : vector<32x128xf32>, vector<32x128xf32>, vector<32x128xf32> -> vector<96x128xf32>
    %66 = tpu.concatenate %57, %58, %59 in 0 : vector<32x128xf32>, vector<32x128xf32>, vector<32x128xf32> -> vector<96x128xf32>
    %67 = tpu.concatenate %63, %64, %65, %66 in 1 : vector<96x128xf32>, vector<96x128xf32>, vector<96x128xf32>, vector<96x128xf32> -> vector<96x512xf32>
    %cst_41 = arith.constant dense<0.000000e+00> : vector<32x512xf32>
    %68 = tpu.matmul %60, %67, %cst_41 {dimension_numbers = #tpu.dot_dimension_numbers<[1], [0], [0], [1], [0, 0, 1, 1], [], []>} : vector<32x96xf32>, vector<96x512xf32>, vector<32x512xf32> -> vector<32x512xf32>
    %69 = vector.broadcast %61 : vector<32x1xf32> to vector<32x512xf32>
    %70 = arith.addf %68, %69 : vector<32x512xf32>
    %cst_42 = arith.constant 0.000000e+00 : f32
    %71 = vector.broadcast %cst_42 : f32 to vector<32x512xf32>
    %72 = arith.cmpf ogt, %70, %71 : vector<32x512xf32>
    %cst_43 = arith.constant 2.000000e-02 : f32
    %73 = vector.broadcast %cst_43 : f32 to vector<32x512xf32>
    %74 = arith.mulf %73, %70 : vector<32x512xf32>
    %75 = arith.select %72, %70, %74 : vector<32x512xi1>, vector<32x512xf32>
    %76 = vector.extract_strided_slice %75 {offsets = [0, 0], sizes = [32, 128], strides = [1, 1]} : vector<32x512xf32> to vector<32x128xf32>
    %77 = vector.extract_strided_slice %75 {offsets = [0, 128], sizes = [32, 128], strides = [1, 1]} : vector<32x512xf32> to vector<32x128xf32>
    %78 = vector.extract_strided_slice %75 {offsets = [0, 256], sizes = [32, 128], strides = [1, 1]} : vector<32x512xf32> to vector<32x128xf32>
    %79 = vector.extract_strided_slice %75 {offsets = [0, 384], sizes = [32, 128], strides = [1, 1]} : vector<32x512xf32> to vector<32x128xf32>
    %c64 = arith.constant 64 : index
    %c0_44 = arith.constant 0 : index
    %80 = vector.load %arg2[%c64, %c0_44] : memref<320x256xf32, #tpu.memory_space<vmem>>, vector<64x96xf32>
    %c64_45 = arith.constant 64 : index
    %c96_46 = arith.constant 96 : index
    %81 = vector.load %arg2[%c64_45, %c96_46] : memref<320x256xf32, #tpu.memory_space<vmem>>, vector<64x1xf32>
    %cst_47 = arith.constant 0.000000e+00 : f32
    %82 = vector.broadcast %cst_47 : f32 to vector<32x128xf32>
    %83 = tpu.concatenate %82, %76, %77 in 0 : vector<32x128xf32>, vector<32x128xf32>, vector<32x128xf32> -> vector<96x128xf32>
    %84 = tpu.concatenate %77, %78, %79 in 0 : vector<32x128xf32>, vector<32x128xf32>, vector<32x128xf32> -> vector<96x128xf32>
    %85 = tpu.concatenate %83, %84 in 1 : vector<96x128xf32>, vector<96x128xf32> -> vector<96x256xf32>
    %cst_48 = arith.constant dense<0.000000e+00> : vector<64x256xf32>
    %86 = tpu.matmul %80, %85, %cst_48 {dimension_numbers = #tpu.dot_dimension_numbers<[1], [0], [0], [1], [0, 0, 1, 1], [], []>} : vector<64x96xf32>, vector<96x256xf32>, vector<64x256xf32> -> vector<64x256xf32>
    %87 = vector.broadcast %81 : vector<64x1xf32> to vector<64x256xf32>
    %88 = arith.addf %86, %87 : vector<64x256xf32>
    %cst_49 = arith.constant 0.000000e+00 : f32
    %89 = vector.broadcast %cst_49 : f32 to vector<64x256xf32>
    %90 = arith.cmpf ogt, %88, %89 : vector<64x256xf32>
    %cst_50 = arith.constant 2.000000e-02 : f32
    %91 = vector.broadcast %cst_50 : f32 to vector<64x256xf32>
    %92 = arith.mulf %91, %88 : vector<64x256xf32>
    %93 = arith.select %90, %88, %92 : vector<64x256xi1>, vector<64x256xf32>
    %94 = vector.extract_strided_slice %93 {offsets = [0, 0], sizes = [64, 128], strides = [1, 1]} : vector<64x256xf32> to vector<64x128xf32>
    %95 = vector.extract_strided_slice %93 {offsets = [0, 128], sizes = [64, 128], strides = [1, 1]} : vector<64x256xf32> to vector<64x128xf32>
    %c128 = arith.constant 128 : index
    %c0_51 = arith.constant 0 : index
    %96 = vector.load %arg2[%c128, %c0_51] : memref<320x256xf32, #tpu.memory_space<vmem>>, vector<64x192xf32>
    %c128_52 = arith.constant 128 : index
    %c192 = arith.constant 192 : index
    %97 = vector.load %arg2[%c128_52, %c192] : memref<320x256xf32, #tpu.memory_space<vmem>>, vector<64x1xf32>
    %cst_53 = arith.constant 0.000000e+00 : f32
    %98 = vector.broadcast %cst_53 : f32 to vector<64x128xf32>
    %99 = tpu.concatenate %98, %94, %95 in 0 : vector<64x128xf32>, vector<64x128xf32>, vector<64x128xf32> -> vector<192x128xf32>
    %cst_54 = arith.constant dense<0.000000e+00> : vector<64x128xf32>
    %100 = tpu.matmul %96, %99, %cst_54 {dimension_numbers = #tpu.dot_dimension_numbers<[1], [0], [0], [1], [0, 0, 1, 1], [], []>} : vector<64x192xf32>, vector<192x128xf32>, vector<64x128xf32> -> vector<64x128xf32>
    %101 = vector.broadcast %97 : vector<64x1xf32> to vector<64x128xf32>
    %102 = arith.addf %100, %101 : vector<64x128xf32>
    %cst_55 = arith.constant 0.000000e+00 : f32
    %103 = vector.broadcast %cst_55 : f32 to vector<64x128xf32>
    %104 = arith.cmpf ogt, %102, %103 : vector<64x128xf32>
    %cst_56 = arith.constant 2.000000e-02 : f32
    %105 = vector.broadcast %cst_56 : f32 to vector<64x128xf32>
    %106 = arith.mulf %105, %102 : vector<64x128xf32>
    %107 = arith.select %104, %102, %106 : vector<64x128xi1>, vector<64x128xf32>
    %c192_57 = arith.constant 192 : index
    %c0_58 = arith.constant 0 : index
    %108 = vector.load %arg2[%c192_57, %c0_58] : memref<320x256xf32, #tpu.memory_space<vmem>>, vector<64x64xf32>
    %c192_59 = arith.constant 192 : index
    %c64_60 = arith.constant 64 : index
    %109 = vector.load %arg2[%c192_59, %c64_60] : memref<320x256xf32, #tpu.memory_space<vmem>>, vector<64x1xf32>
    %cst_61 = arith.constant dense<0.000000e+00> : vector<64x128xf32>
    %110 = tpu.matmul %108, %107, %cst_61 {dimension_numbers = #tpu.dot_dimension_numbers<[1], [0], [0], [1], [0, 0, 1, 1], [], []>} : vector<64x64xf32>, vector<64x128xf32>, vector<64x128xf32> -> vector<64x128xf32>
    %111 = vector.broadcast %109 : vector<64x1xf32> to vector<64x128xf32>
    %112 = arith.addf %110, %111 : vector<64x128xf32>
    %cst_62 = arith.constant 0.000000e+00 : f32
    %113 = vector.broadcast %cst_62 : f32 to vector<64x128xf32>
    %114 = arith.cmpf ogt, %112, %113 : vector<64x128xf32>
    %cst_63 = arith.constant 2.000000e-02 : f32
    %115 = vector.broadcast %cst_63 : f32 to vector<64x128xf32>
    %116 = arith.mulf %115, %112 : vector<64x128xf32>
    %117 = arith.select %114, %112, %116 : vector<64x128xi1>, vector<64x128xf32>
    %c256 = arith.constant 256 : index
    %c0_64 = arith.constant 0 : index
    %118 = vector.load %arg2[%c256, %c0_64] : memref<320x256xf32, #tpu.memory_space<vmem>>, vector<64x64xf32>
    %c256_65 = arith.constant 256 : index
    %c64_66 = arith.constant 64 : index
    %119 = vector.load %arg2[%c256_65, %c64_66] : memref<320x256xf32, #tpu.memory_space<vmem>>, vector<64x1xf32>
    %cst_67 = arith.constant dense<0.000000e+00> : vector<64x128xf32>
    %120 = tpu.matmul %118, %117, %cst_67 {dimension_numbers = #tpu.dot_dimension_numbers<[1], [0], [0], [1], [0, 0, 1, 1], [], []>} : vector<64x64xf32>, vector<64x128xf32>, vector<64x128xf32> -> vector<64x128xf32>
    %121 = vector.broadcast %119 : vector<64x1xf32> to vector<64x128xf32>
    %122 = arith.addf %120, %121 : vector<64x128xf32>
    %c0_68 = arith.constant 0 : index
    %c0_69 = arith.constant 0 : index
    %123 = vector.load %arg3[%c0_68, %c0_69] : memref<64x128xf32, #tpu.memory_space<vmem>>, vector<64x128xf32>
    tpu.vector_store %arg3[%c0_68, %c0_69], %122 {strides = array<i32>} : memref<64x128xf32, #tpu.memory_space<vmem>>, vector<64x128xf32>,
    return
  }
  func.func @transform_0(%arg0: i32) -> (i32, i32, i32) {
    %c0_i32 = arith.constant 0 : i32
    %c0_i32_0 = arith.constant 0 : i32
    %c0_i32_1 = arith.constant 0 : i32
    return %c0_i32, %c0_i32_0, %arg0 : i32, i32, i32
  }
  func.func @transform_1(%arg0: i32) -> (i32, i32) {
    %c0_i32 = arith.constant 0 : i32
    %c0_i32_0 = arith.constant 0 : i32
    %c0_i32_1 = arith.constant 0 : i32
    return %c0_i32, %c0_i32_0 : i32, i32
  }
  func.func @transform_2(%arg0: i32) -> (i32, i32) {
    %c0_i32 = arith.constant 0 : i32
    %c0_i32_0 = arith.constant 0 : i32
    return %c0_i32, %arg0 : i32, i32
  }
}

</mosaic_0001>

<bundles_post_ra>
// kernel: audionet_forward.1
= control target key start
LH: loop header
LB: loop body
LE: loop exit
PB: predicated region body
PF: predicated region fallthrough
CT: control target
= control target key end

     0   :  { %vm115_vm0 = vcmask 1041408   ;;  %vm381_vm1 = vcmask 1046528   ;;  %v1712_v8 = vmov 87   ;;  %vm98_vm2 = vcmask 1044480   ;;  %s2767_s0 = inlined_call_operand.vmem [shape: f32[16,29,128], index: 0, kind: input, shape index: {}]   ;;  %s2768_s1 = inlined_call_operand.vmem [shape: f32[320,256], index: 1, kind: input, shape index: {}]   ;;  %s2769_s2 = inlined_call_operand.vmem [shape: f32[64,128], index: 2, kind: output, shape index: {}]  }
   0x1   :  { %v1734_v0 = vld [vmem:[%s2767_s0 + $0x30] sm:$0xff]  ;;  %v1739_v1 = vld [vmem:[%s2767_s0 + $0x38] sm:$0x1f]  ;;  %v1757_v7 = vld [vmem:[%s2767_s0 + $0x28] sm:$0xff]  ;;  %1705 = vset.pattern.permute.xlu1 %v1712_v8  ;;  %1704 = vset.pattern.permute.xlu0 %v1712_v8  ;;  %vm372_vm4 = vcmask 711680  }
   0x2   :  { %v1744_v2 = vld [vmem:[%s2767_s0 + $0x70] sm:$0xff]  ;;  %v119_v3 = vrot.slane %v1734_v0, 6  ;;  %v121_v4 = vrot.slane %v1739_v1, 6  ;;  %v1751_v5 = vld [vmem:[%s2767_s0 + $0x78] sm:$0x1f]  ;;  %v117_v10 = vrot.slane %v1757_v7, 6  ;;  %vm1900_vm3 = vmneg %vm98_vm2 }
   0x3   :  { %v151_v6 = vrot.slane %v1744_v2, 6  ;;  %v153_v9 = vrot.slane %v1751_v5, 6  ;;  %v1764_v11 = vld [vmem:[%s2767_s0 + $0x68] sm:$0xff]  ;;  %v1769_v12 = vld [vmem:[%s2767_s0 + $0x20] sm:$0xff]  ;;  %v14_v18 = vld [vmem:[%s2767_s0 + $0x18] sm:$0x1f] }
   0x4   :  { %v1774_v13 = vld [vmem:[%s2767_s0 + $0x60] sm:$0xff]  ;;  %v122_v14 = vsel %vm115_vm0, %v119_v3, %v121_v4  ;;  %v149_v15 = vrot.slane %v1764_v11, 6  ;;  %v116_v16 = vrot.slane %v1769_v12, 6  ;;  %v13_v19 = vld [vmem:[%s2767_s0 + $0x10] sm:$0xff]  ;;  %v120_v21 = vsel %vm115_vm0, %v117_v10, %v119_v3  ;;  %v1549_v23 = vld [vmem:[%s2767_s0 + $0x58] sm:$0x1f] }
   0x5   :  { %v148_v17 = vrot.slane %v1774_v13, 6  ;;  %1602 = vmatpush.msk.msra.mxu2 %vm381_vm1, %v122_v14  ;;  %v154_v20 = vsel %vm115_vm0, %v151_v6, %v153_v9  ;;  %v104_v22 = vrot.slane %v14_v18, 3  ;;  %v1548_v24 = vld [vmem:[%s2767_s0 + $0x50] sm:$0xff]  ;;  %v12_v25 = vld [vmem:[%s2767_s0 + $0x8] sm:$0xff]  ;;  %v137_v28 = vrot.slane %v1549_v23, 3  ;;  %v1807_v31 = vld [vmem:[%s2767_s0] sm:$0xff] }
   0x6   :  { %1609 = vmatpush.msk.msra.mxu3 %vm381_vm1, %v154_v20  ;;  %v152_v26 = vsel %vm115_vm0, %v149_v15, %v151_v6  ;;  %v118_v27 = vsel %vm115_vm0, %v116_v16, %v117_v10  ;;  %v102_v29 = vrot.slane %v13_v19, 3  ;;  %v1547_v30 = vld [vmem:[%s2767_s0 + $0x48] sm:$0xff]  ;;  %v135_v33 = vrot.slane %v1548_v24, 3  ;;  %v1813_v34 = vld [vmem:[%s2767_s0 + $0x40] sm:$0xff]  ;;  %v1818_v35 = vld [vmem:[%s2767_s0 + $0x170] sm:$0xff] }
   0x7   :  { %404 = vmatpush.msra.mxu2 %v120_v21  ;;  %v150_v32 = vsel %vm115_vm0, %v148_v17, %v149_v15  ;;  %v1823_v36 = vld [vmem:[%s2767_s0 + $0x178] sm:$0x1f]  ;;  %v127_v37 = vsel %vm115_vm0, %v104_v22, %v116_v16  ;;  %v100_v38 = vrot.slane %v12_v25, 3  ;;  %v1829_v39 = vld [vmem:[%s2767_s0 + $0x168] sm:$0xff]  ;;  %v1834_v40 = vld [vmem:[%s2767_s0 + $0x160] sm:$0xff]  ;;  %v159_v42 = vsel %vm115_vm0, %v137_v28, %v148_v17 }
   0x8   :  { %433 = vmatpush.msra.mxu3 %v152_v26  ;;  %v1839_v41 = vld [vmem:[%s2768_s1 + $0x10] sm:$0xff]  ;;  %v133_v43 = vrot.slane %v1547_v30, 3  ;;  %v279_v44 = vrot.slane %v1818_v35, 6  ;;  %v281_v45 = vrot.slane %v1823_v36, 6  ;;  %v1581_v46 = vld [vmem:[%s2767_s0 + $0x158] sm:$0x1f]  ;;  %v105_v48 = vsel %vm98_vm2, %v102_v29, %v104_v22 }
   0x9   :  { %405 = vmatpush.msra.mxu2 %v118_v27  ;;  %359 = vperm.xlu1 %1705, %v1839_v41   ;;  %v1851_v47 = vld [vmem:[%s2767_s0 + $0x130] sm:$0xff]  ;;  %v138_v49 = vsel %vm98_vm2, %v135_v33, %v137_v28  ;;  %v99_v50 = vrot.slane %v1807_v31, 3  ;;  %v132_v51 = vrot.slane %v1813_v34, 3  ;;  %v1860_v52 = vld [vmem:[%s2767_s0 + $0x138] sm:$0x1f]  ;;  %v277_v55 = vrot.slane %v1829_v39, 6 }
   0xa   :  { %434 = vmatpush.msra.mxu3 %v150_v32  ;;  %v1580_v53 = vld [vmem:[%s2767_s0 + $0x150] sm:$0xff]  ;;  %v282_v54 = vsel %vm115_vm0, %v279_v44, %v281_v45  ;;  %v276_v56 = vrot.slane %v1834_v40, 6  ;;  %v265_v57 = vrot.slane %v1581_v46, 3  ;;  %v103_v58 = vsel %vm98_vm2, %v100_v38, %v102_v29  ;;  %v1875_v61 = vld [vmem:[%s2767_s0 + $0x128] sm:$0xff]  ;;  %v1886_v8 = vld [vmem:[%s2767_s0 + $0x120] sm:$0xff] }
   0xb   :  { %406 = vmatpush.msra.mxu2 %v127_v37  ;;  %1629 = vmatpush.msk.msra.mxu1 %vm381_vm1, %v282_v54  ;;  %v247_v59 = vrot.slane %v1851_v47, 6  ;;  %v249_v60 = vrot.slane %v1860_v52, 6  ;;  %v1579_v62 = vld [vmem:[%s2767_s0 + $0x148] sm:$0xff]  ;;  %v136_v63 = vsel %vm98_vm2, %v133_v43, %v135_v33  ;;  %v280_v3 = vsel %vm115_vm0, %v277_v55, %v279_v44  ;;  %v1893_v14 = vld [vmem:[%s2767_s0 + $0x140] sm:$0xff]  ;;  %v1573_v22 = vld [vmem:[%s2767_s0 + $0x118] sm:$0x1f] }
   0xc   :  { %435 = vmatpush.msra.mxu3 %v159_v42  ;;  %v278_v4 = vsel %vm115_vm0, %v276_v56, %v277_v55  ;;  %v263_v6 = vrot.slane %v1580_v53, 3  ;;  %v101_v9 = vsel %vm98_vm2, %v99_v50, %v100_v38  ;;  %v134_v15 = vsel %vm98_vm2, %v132_v51, %v133_v43  ;;  %v1907_v20 = vld [vmem:[%s2768_s1] sm:$0xff]  ;;  %v1919_v25 = vld [vmem:[%s2767_s0 + $0xb0] sm:$0xff]  ;;  %v1924_v26 = vld [vmem:[%s2767_s0 + $0xb8] sm:$0x1f] }
   0xd   :  { %407 = vmatpush.msra.mxu2 %v105_v48  ;;  %549 = vmatpush.msra.mxu1 %v280_v3  ;;  %v250_v10 = vsel %vm115_vm0, %v247_v59, %v249_v60  ;;  %v287_v16 = vsel %vm115_vm0, %v265_v57, %v276_v56  ;;  %v245_v17 = vrot.slane %v1875_v61, 6  ;;  %v261_v18 = vrot.slane %v1579_v62, 3  ;;  %v1935_v29 = vld [vmem:[%s2767_s0 + $0xf0] sm:$0xff]  ;;  %v1940_v30 = vld [vmem:[%s2767_s0 + $0xf8] sm:$0x1f]  ;;  %v1949_v33 = vld [vmem:[%s2767_s0 + $0xa8] sm:$0xff] }
   0xe   :  { %436 = vmatpush.msra.mxu3 %v138_v49  ;;  %1624 = vmatpush.msk.msra.mxu0 %vm381_vm1, %v250_v10  ;;  %v244_v21 = vrot.slane %v1886_v8, 6  ;;  %v158_v23 = vsel %vm98_vm2, %v1739_v1, %v132_v51  ;;  %v266_v24 = vsel %vm98_vm2, %v263_v6, %v265_v57  ;;  %v260_v28 = vrot.slane %v1893_v14, 3  ;;  %v1572_v1 = vld [vmem:[%s2767_s0 + $0x110] sm:$0xff]  ;;  %v1571_v37 = vld [vmem:[%s2767_s0 + $0x108] sm:$0xff]  ;;  %v1570_v53 = vld [vmem:[%s2767_s0 + $0x100] sm:$0xff] }
   0xf   :  { %408 = vmatpush.msra.mxu2 %v103_v58  ;;  %550 = vmatpush.msra.mxu1 %v278_v4  ;;  %v248_v27 = vsel %vm115_vm0, %v245_v17, %v247_v59  ;;  %v264_v32 = vsel %vm98_vm2, %v261_v18, %v263_v6  ;;  %v233_v34 = vrot.slane %v1573_v22, 3  ;;  %v183_v38 = vrot.slane %v1919_v25, 6  ;;  %v1959_v43 = vld [vmem:[%s2767_s0 + $0xe8] sm:$0xff]  ;;  %v1979_v55 = vld [vmem:[%s2767_s0 + $0xe0] sm:$0xff]  ;;  %v1565_v62 = vld [vmem:[%s2767_s0 + $0xd8] sm:$0x1f] }
  0x10   :  { %437 = vmatpush.msra.mxu3 %v136_v63  ;;  %v246_v31 = vsel %vm115_vm0, %v244_v21, %v245_v17  ;;  %520 = vmatpush.msra.mxu0 %v248_v27  ;;  %v185_v42 = vrot.slane %v1924_v26, 6  ;;  %v231_v44 = vrot.slane %v1572_v1, 3  ;;  %v1713_v45 = vmov 0.0   ;;  %v1564_v14 = vld [vmem:[%s2767_s0 + $0xd0] sm:$0xff]  ;;  %v1563_v19 = vld [vmem:[%s2767_s0 + $0xc8] sm:$0xff]  ;;  %v1562_v1 = vld [vmem:[%s2767_s0 + $0xc0] sm:$0xff] }
  0x11   :  { %409 = vmatpush.msra.mxu2 %v101_v9  ;;  %354 = vperm.xlu1 %1705, %v1907_v20   ;;  %v215_v46 = vrot.slane %v1935_v29, 6  ;;  %v217_v48 = vrot.slane %v1940_v30, 6  ;;  %v262_v49 = vsel %vm98_vm2, %v260_v28, %v261_v18  ;;  %v255_v51 = vsel %vm115_vm0, %v233_v34, %v244_v21 }
  0x12   :  { %438 = vmatpush.msra.mxu3 %v134_v15  ;;  %551 = vmatpush.msra.mxu1 %v287_v16  ;;  %v181_v54 = vrot.slane %v1949_v33, 6  ;;  %v234_v56 = vsel %vm98_vm2, %v231_v44, %v233_v34  ;;  %v229_v57 = vrot.slane %v1571_v37, 3  ;;  %v213_v58 = vrot.slane %v1959_v43, 6  ;;  %v1555_v16 = vld [vmem:[%s2767_s0 + $0x88] sm:$0xff] }
  0x13   :  { %1604 = vmatpush.msk.msra.mxu2 %vm1900_vm3, %v99_v50  ;;  %521 = vmatpush.msra.mxu0 %v246_v31  ;;  %v1968_v50 = vld [vmem:[%s2767_s0 + $0xa0] sm:$0xff]  ;;  %v186_v59 = vsel %vm115_vm0, %v183_v38, %v185_v42  ;;  %v228_v63 = vrot.slane %v1570_v53, 3  ;;  %v218_v3 = vsel %vm115_vm0, %v215_v46, %v217_v48  ;;  %v212_v4 = vrot.slane %v1979_v55, 6 }
  0x14   :  { %439 = vmatpush.msra.mxu3 %v158_v23  ;;  %552 = vmatpush.msra.mxu1 %v266_v24  ;;  %v180_v60 = vrot.slane %v1968_v50, 6  ;;  %v286_v6 = vsel %vm98_vm2, %v1860_v52, %v260_v28  ;;  %v184_v9 = vsel %vm115_vm0, %v181_v54, %v183_v38  ;;  %v232_v15 = vsel %vm98_vm2, %v229_v57, %v231_v44  ;;  %v1554_v24 = vld [vmem:[%s2767_s0 + $0x80] sm:$0xff] }
  0x15   :  { %411 = vmatpush.msra.mxu2 %v1713_v45  ;;  %522 = vmatpush.msra.mxu0 %v255_v51  ;;  %v216_v52 = vsel %vm115_vm0, %v213_v58, %v215_v46  ;;  %v230_v21 = vsel %vm98_vm2, %v228_v63, %v229_v57  ;;  %v214_v22 = vsel %vm115_vm0, %v212_v4, %v213_v58  ;;  %v199_v23 = vrot.slane %v1564_v14, 3  ;;  %v2059_v51 = vld [vmem:[%s2767_s0 + $0x1b0] sm:$0xff]  ;;  %v2069_v53 = vld [vmem:[%s2768_s1 + $0x20] sm:$0xff]  ;;  %v1587_v14 = vld [vmem:[%s2767_s0 + $0x188] sm:$0xff] }
  0x16   :  { %440 = vmatpush.msra.mxu3 %v1734_v0  ;;  %553 = vmatpush.msra.mxu1 %v264_v32  ;;  %v1557_v0 = vld [vmem:[%s2767_s0 + $0x98] sm:$0x1f]  ;;  %v182_v17 = vsel %vm115_vm0, %v180_v60, %v181_v54  ;;  %v165_v28 = vrot.slane %v1555_v16, 3  ;;  %v254_v31 = vsel %vm98_vm2, %v1940_v30, %v228_v63  ;;  %v197_v34 = vrot.slane %v1563_v19, 3 }
  0x17   :  { %412 = vmatpush.msra.mxu2 %v1713_v45  ;;  %523 = vmatpush.msra.mxu0 %v234_v56  ;;  %v169_v10 = vrot.slane %v1557_v0, 3  ;;  %v164_v38 = vrot.slane %v1554_v24, 3  ;;  %v196_v42 = vrot.slane %v1562_v1, 3  ;;  %v1601_v56 = vld [vmem:[%s2767_s0 + $0x1f8] sm:$0x1f]  ;;  %v311_v57 = vrot.slane %v2059_v51, 6 }
  0x18   :  { %441 = vmatpush.msra.mxu3 %v1757_v7  ;;  %554 = vmatpush.msra.mxu1 %v262_v49  ;;  %v1556_v7 = vld [vmem:[%s2767_s0 + $0x90] sm:$0xff]  ;;  %v200_v44 = vsel %vm98_vm2, %v197_v34, %v199_v23  ;;  %v345_v0 = vrot.slane %v1601_v56, 6  ;;  %v293_v19 = vrot.slane %v1587_v14, 3 }
  0x19   :  { %413 = vmatpush.msra.mxu2 %v1713_v45  ;;  %v167_v18 = vrot.slane %v1556_v7, 3  ;;  %524 = vmatpush.msra.mxu0 %v232_v15  ;;  %v191_v27 = vsel %vm115_vm0, %v169_v10, %v180_v60  ;;  %v166_v46 = vsel %vm98_vm2, %v164_v38, %v165_v28  ;;  %v198_v48 = vsel %vm98_vm2, %v196_v42, %v197_v34 }
  0x1a   :  { %442 = vmatpush.msra.mxu3 %v1769_v12  ;;  %1605 = vmatmul.msk.f32.vlgmr.msra.gmra.mxu2 %vm372_vm4, %v1907_v20  ;;  %v201_v12 = vrot.slane %v1565_v62, 3  ;;  %v190_v49 = vsel %vm98_vm2, %v1751_v5, %v164_v38  ;;  %v222_v54 = vsel %vm98_vm2, %v1924_v26, %v196_v42  ;;  %v1600_v5 = vld [vmem:[%s2767_s0 + $0x1f0] sm:$0xff]  ;;  %v2086_v26 = vld [vmem:[%s2767_s0 + $0x1a8] sm:$0xff]  ;;  %v1598_v62 = vld [vmem:[%s2767_s0 + $0x1e0] sm:$0xff] }
  0x1b   :  { %1610 = vmatmul.msk.f32.vlgmr.msra.gmra.mxu3 %vm372_vm4, %v1907_v20  ;;  %1614 = vmatpush.msk.msrb.mxu2 %vm381_vm1, %v186_v59  ;;  %v170_v37 = vsel %vm98_vm2, %v167_v18, %v169_v10  ;;  %v168_v30 = vsel %vm98_vm2, %v165_v28, %v167_v18  ;;  %v1599_v59 = vld [vmem:[%s2767_s0 + $0x1e8] sm:$0xff]  ;;  %v309_v60 = vrot.slane %v2086_v26, 6 }
  0x1c   :  { %1619 = vmatpush.msk.msrb.mxu3 %vm381_vm1, %v218_v3  ;;  %555 = vmatpush.msra.mxu1 %v286_v6  ;;  %v223_v32 = vsel %vm115_vm0, %v201_v12, %v212_v4  ;;  %v341_v63 = vrot.slane %v1599_v59, 6  ;;  %v340_v4 = vrot.slane %v1598_v62, 6 }
  0x1d   :  { %462 = vmatpush.msrb.mxu2 %v184_v9  ;;  %525 = vmatpush.msra.mxu0 %v230_v21  ;;  %v312_v6 = vsel %vm115_vm0, %v309_v60, %v311_v57  ;;  %v1596_v9 = vld [vmem:[%s2767_s0 + $0x1d0] sm:$0xff]  ;;  %v1594_v21 = vld [vmem:[%s2767_s0 + $0x1c0] sm:$0xff] }
  0x1e   :  { %491 = vmatpush.msrb.mxu3 %v216_v52  ;;  %556 = vmatpush.msra.mxu1 %v1851_v47  ;;  %v202_v47 = vsel %vm98_vm2, %v199_v23, %v201_v12  ;;  %v1595_v52 = vld [vmem:[%s2767_s0 + $0x1c8] sm:$0xff]  ;;  %v342_v12 = vsel %vm115_vm0, %v340_v4, %v341_v63  ;;  %v327_v16 = vrot.slane %v1596_v9, 3  ;;  %v324_v1 = vrot.slane %v1594_v21, 3 }
  0x1f   :  { %463 = vmatpush.msrb.mxu2 %v182_v17  ;;  %526 = vmatpush.msra.mxu0 %v254_v31  ;;  %v1586_v17 = vld [vmem:[%s2767_s0 + $0x180] sm:$0xff]  ;;  %v325_v23 = vrot.slane %v1595_v52, 3 }
  0x20   :  { %492 = vmatpush.msrb.mxu3 %v214_v22  ;;  %557 = vmatpush.msra.mxu1 %v1875_v61  ;;  %v2046_v61 = vld [vmem:[%s2768_s1 + $0x30] sm:$0xff] }
  0x21   :  { %464 = vmatpush.msrb.mxu2 %v191_v27  ;;  %369 = vperm.xlu0 %1704, %v2046_v61   ;;  %v292_v27 = vrot.slane %v1586_v17, 3 }
  0x22   :  { %1606 = vmatmul.msk.f32.gmra.mxu2 %vm372_vm4, %v1839_v41  ;;  %493 = vmatpush.msrb.mxu3 %v223_v32  ;;  %v328_v32 = vsel %vm98_vm2, %v325_v23, %v327_v16 }
  0x23   :  { %1611 = vmatmul.msk.f32.gmra.mxu3 %vm372_vm4, %v1839_v41  ;;  %465 = vmatpush.msrb.mxu2 %v170_v37  ;;  %v294_v34 = vsel %vm98_vm2, %v292_v27, %v293_v19  ;;  %v326_v37 = vsel %vm98_vm2, %v324_v1, %v325_v23  ;;  %v318_v38 = vsel %vm98_vm2, %v1823_v36, %v292_v27 }
  0x24   :  { %494 = vmatpush.msrb.mxu3 %v202_v47  ;;  %558 = vmatpush.msra.mxu1 %v1886_v8  ;;  %v2064_v8 = vld [vmem:[%s2767_s0 + $0x1b8] sm:$0x1f] }
  0x25   :  { %466 = vmatpush.msrb.mxu2 %v168_v30  ;;  %1630 = vmatmul.msk.f32.vlgmr.msra.gmra.mxu1 %vm372_vm4, %v1907_v20  ;;  %v313_v58 = vrot.slane %v2064_v8, 6  ;;  %v350_v47 = vsel %vm98_vm2, %v2064_v8, %v324_v1 }
  0x26   :  { %495 = vmatpush.msrb.mxu3 %v200_v44  ;;  %527 = vmatpush.msra.mxu0 %v1935_v29  ;;  %v343_v29 = vrot.slane %v1600_v5, 6 }
  0x27   :  { %467 = vmatpush.msrb.mxu2 %v166_v46 }
  0x28   :  { %496 = vmatpush.msrb.mxu3 %v198_v48  ;;  %528 = vmatpush.msra.mxu0 %v1959_v43  ;;  %v2099_v43 = vld [vmem:[%s2767_s0 + $0x1a0] sm:$0xff] }
  0x29   :  { %468 = vmatpush.msrb.mxu2 %v190_v49  ;;  %v308_v3 = vrot.slane %v2099_v43, 6  ;;  %364 = vperm.xlu0 %1704, %v2069_v53  }
  0x2a   :  { %1607 = vmatmul.msk.f32.gmra.mxu2 %vm372_vm4, %v2069_v53  ;;  %497 = vmatpush.msrb.mxu3 %v222_v54 }
  0x2b   :  { %1612 = vmatmul.msk.f32.gmra.mxu3 %vm372_vm4, %v2069_v53  ;;  %469 = vmatpush.msrb.mxu2 %v1744_v2  ;;  %v314_v2 = vsel %vm115_vm0, %v311_v57, %v313_v58 }
  0x2c   :  { %498 = vmatpush.msrb.mxu3 %v1919_v25  ;;  %529 = vmatpush.msra.mxu0 %v1979_v55  ;;  %v1589_v25 = vld [vmem:[%s2767_s0 + $0x198] sm:$0x1f]  ;;  %v346_v55 = vsel %vm115_vm0, %v343_v29, %v345_v0 }
  0x2d   :  { %470 = vmatpush.msrb.mxu2 %v1764_v11  ;;  %1625 = vmatmul.msk.f32.vlgmr.msra.gmra.mxu0 %vm372_vm4, %v1907_v20  ;;  %v1597_v11 = vld [vmem:[%s2767_s0 + $0x1d8] sm:$0x1f]  ;;  %v297_v7 = vrot.slane %v1589_v25, 3 }
  0x2e   :  { %499 = vmatpush.msrb.mxu3 %v1949_v33  ;;  %1631 = vmatmul.msk.f32.gmra.mxu1 %vm372_vm4, %v1839_v41  ;;  %v1588_v33 = vld [vmem:[%s2767_s0 + $0x190] sm:$0xff]  ;;  %v329_v10 = vrot.slane %v1597_v11, 3 }
  0x2f   :  { %471 = vmatpush.msrb.mxu2 %v1774_v13  ;;  %v344_v13 = vsel %vm115_vm0, %v341_v63, %v343_v29  ;;  %v295_v15 = vrot.slane %v1588_v33, 3  ;;  %v319_v18 = vsel %vm115_vm0, %v297_v7, %v308_v3 }
  0x30   :  { %500 = vmatpush.msrb.mxu3 %v1968_v50  ;;  %v310_v50 = vsel %vm115_vm0, %v308_v3, %v309_v60  ;;  %v351_v22 = vsel %vm115_vm0, %v329_v10, %v340_v4  ;;  %v330_v28 = vsel %vm98_vm2, %v327_v16, %v329_v10 }
  0x31   :  { %1634 = vmatpush.msk.msra.mxu2 %vm381_vm1, %v314_v2  ;;  %v298_v24 = vsel %vm98_vm2, %v295_v15, %v297_v7  ;;  %v296_v31 = vsel %vm98_vm2, %v293_v19, %v295_v15 }
  0x32   :  { %1639 = vmatpush.msk.msra.mxu3 %vm381_vm1, %v346_v55  ;;  %1608 = vmatmul.msk.f32.gmra.mxu2 %vm372_vm4, %v2046_v61 }
  0x33   :  { %1613 = vmatmul.msk.f32.gmra.mxu3 %vm372_vm4, %v2046_v61  ;;  %578 = vmatpush.msra.mxu2 %v312_v6 }
  0x34   :  { %607 = vmatpush.msra.mxu3 %v344_v13 }
  0x35   :  { %1626 = vmatmul.msk.f32.gmra.mxu0 %vm372_vm4, %v1839_v41  ;;  %579 = vmatpush.msra.mxu2 %v310_v50 }
  0x36   :  { %1632 = vmatmul.msk.f32.gmra.mxu1 %vm372_vm4, %v2069_v53  ;;  %608 = vmatpush.msra.mxu3 %v342_v12 }
  0x37   :  { %580 = vmatpush.msra.mxu2 %v319_v18 }
  0x38   :  { %609 = vmatpush.msra.mxu3 %v351_v22 }
  0x39   :  { %581 = vmatpush.msra.mxu2 %v298_v24 }
  0x3a   :  { %1615 = vmatmul.msk.f32.vlgmr.msrb.gmra.mxu2 %vm372_vm4, %v1907_v20  ;;  %610 = vmatpush.msra.mxu3 %v330_v28 }
  0x3b   :  { %1620 = vmatmul.msk.f32.vlgmr.msrb.gmra.mxu3 %vm372_vm4, %v1907_v20  ;;  %582 = vmatpush.msra.mxu2 %v296_v31 }
  0x3c   :  { %611 = vmatpush.msra.mxu3 %v328_v32 }
  0x3d   :  { %1627 = vmatmul.msk.f32.gmra.mxu0 %vm372_vm4, %v2069_v53  ;;  %583 = vmatpush.msra.mxu2 %v294_v34 }
  0x3e   :  { %1633 = vmatmul.msk.f32.gmra.mxu1 %vm372_vm4, %v2046_v61  ;;  %612 = vmatpush.msra.mxu3 %v326_v37 }
  0x3f   :  { %584 = vmatpush.msra.mxu2 %v318_v38 }
  0x40   :  { %613 = vmatpush.msra.mxu3 %v350_v47 }
  0x41   :  { %585 = vmatpush.msra.mxu2 %v1818_v35 }
  0x42   :  { %1616 = vmatmul.msk.f32.gmra.mxu2 %vm372_vm4, %v1839_v41  ;;  %614 = vmatpush.msra.mxu3 %v2059_v51 }
  0x43   :  { %1621 = vmatmul.msk.f32.gmra.mxu3 %vm372_vm4, %v1839_v41  ;;  %586 = vmatpush.msra.mxu2 %v1829_v39 }
  0x44   :  { %615 = vmatpush.msra.mxu3 %v2086_v26 }
  0x45   :  { %1628 = vmatmul.msk.f32.gmra.mxu0 %vm372_vm4, %v2046_v61  ;;  %587 = vmatpush.msra.mxu2 %v1834_v40 }
  0x46   :  { %616 = vmatpush.msra.mxu3 %v2099_v43 }
  0x4a   :  { %1617 = vmatmul.msk.f32.gmra.mxu2 %vm372_vm4, %v2069_v53 }
  0x4b   :  { %1622 = vmatmul.msk.f32.gmra.mxu3 %vm372_vm4, %v2069_v53 }
  0x52   :  { %1618 = vmatmul.msk.f32.gmra.mxu2 %vm372_vm4, %v2046_v61 }
  0x53   :  { %1623 = vmatmul.msk.f32.gmra.mxu3 %vm372_vm4, %v2046_v61 }
  0x5a   :  { %1635 = vmatmul.msk.f32.vlgmr.msra.gmra.mxu2 %vm372_vm4, %v1907_v20 }
  0x5b   :  { %1640 = vmatmul.msk.f32.vlgmr.msra.gmra.mxu3 %vm372_vm4, %v1907_v20 }
  0x62   :  { %1636 = vmatmul.msk.f32.gmra.mxu2 %vm372_vm4, %v1839_v41 }
  0x63   :  { %1641 = vmatmul.msk.f32.gmra.mxu3 %vm372_vm4, %v1839_v41 }
  0x6a   :  { %1637 = vmatmul.msk.f32.gmra.mxu2 %vm372_vm4, %v2069_v53 }
  0x6b   :  { %1642 = vmatmul.msk.f32.gmra.mxu3 %vm372_vm4, %v2069_v53 }
  0x72   :  { %1638 = vmatmul.msk.f32.gmra.mxu2 %vm372_vm4, %v2046_v61 }
  0x73   :  { %1643 = vmatmul.msk.f32.gmra.mxu3 %vm372_vm4, %v2046_v61 }
  0x7b   :  { %v2217_v30 = vpop.permute.xlu1 %359 }
  0x83   :  { %v2221_v53 = vpop.permute.xlu1 %354 }
  0x93   :  { %v2213_v42 = vpop.permute.xlu0 %369 }
  0x9b   :  { %v2219_v49 = vpop.permute.xlu0 %364 }
  0x9d   :  { %v415_v35 = vpop.f32.mrf.mxu2 }
  0x9e   :  { %v444_v36 = vpop.f32.mrf.mxu3  ;;  %v2231_v62 = vadd.f32 %v415_v35, %v2221_v53 }
  0x9f   :  { %v445_v58 = vadd.f32 %v444_v36, %v2221_v53 }
  0xa0   :  { %v662_v28 = vmul.f32 0.02, %v2231_v62  ;;  %vm630_vm2 = vcmp.gt.f32.partialorder %v2231_v62, 0.0 }
  0xa1   :  { %v663_v11 = vmul.f32 0.02, %v445_v58  ;;  %vm631_vm9 = vcmp.gt.f32.partialorder %v445_v58, 0.0 }
  0xa2   :  { %v560_v39 = vpop.f32.mrf.mxu1 }
  0xa3   :  { %v561_v29 = vadd.f32 %v560_v39, %v2221_v53  ;;  %v2255_v18 = vsel %vm631_vm9, %v445_v58, %v663_v11 }
  0xa5   :  { %v418_v40 = vpop.f32.mrf.mxu2  ;;  %v667_v6 = vmul.f32 0.02, %v561_v29  ;;  %vm635_vm13 = vcmp.gt.f32.partialorder %v561_v29, 0.0 }
  0xa6   :  { %v447_v20 = vpop.f32.mrf.mxu3  ;;  %v419_v50 = vadd.f32 %v418_v40, %v2217_v30 }
  0xa7   :  { %v448_v56 = vadd.f32 %v447_v20, %v2217_v30  ;;  %v2267_v34 = vsel %vm635_vm13, %v561_v29, %v667_v6 }
  0xa8   :  { %v670_v27 = vmul.f32 0.02, %v419_v50  ;;  %vm638_vm15 = vcmp.gt.f32.partialorder %v419_v50, 0.0 }
  0xa9   :  { %v671_v25 = vmul.f32 0.02, %v448_v56  ;;  %vm639_vm7 = vcmp.gt.f32.partialorder %v448_v56, 0.0 }
  0xaa   :  { %v2215_v41 = vpop.f32.mrf.mxu0  ;;  %v702_v39 = vsel %vm638_vm15, %v419_v50, %v670_v27  ;;  %v2306_v50 = vld [vmem:[%s2768_s1 + $0x60] sm:$0xff] }
  0xab   :  { %v563_v44 = vpop.f32.mrf.mxu1  ;;  %v2247_v15 = vsel %vm639_vm7, %v448_v56, %v671_v25  ;;  %v532_v31 = vadd.f32 %v2215_v41, %v2221_v53 }
  0xac   :  { %v564_v43 = vadd.f32 %v563_v44, %v2217_v30  ;;  %v694_v44 = vsel %vm630_vm2, %v2231_v62, %v662_v28  ;;  %v2315_v28 = vld [vmem:[%s2768_s1 + $0x70] sm:$0xff] }
  0xad   :  { %v421_v46 = vpop.f32.mrf.mxu2  ;;  %v666_v20 = vmul.f32 0.02, %v532_v31  ;;  %vm634_vm4 = vcmp.gt.f32.partialorder %v532_v31, 0.0 }
  0xae   :  { %v450_v48 = vpop.f32.mrf.mxu3  ;;  %v422_v33 = vadd.f32 %v421_v46, %v2219_v49  ;;  %v675_v13 = vmul.f32 0.02, %v564_v43  ;;  %vm643_vm11 = vcmp.gt.f32.partialorder %v564_v43, 0.0 }
  0xaf   :  { %v451_v61 = vadd.f32 %v450_v48, %v2219_v49  ;;  %v698_v48 = vsel %vm634_vm4, %v532_v31, %v666_v20  ;;  %v2345_v20 = vld [vmem:[%s2768_s1 + $0xe0] sm:$0xff] }
  0xb0   :  { %v678_v19 = vmul.f32 0.02, %v422_v33  ;;  %vm646_vm14 = vcmp.gt.f32.partialorder %v422_v33, 0.0  ;;  %v2260_v23 = vsel %vm643_vm11, %v564_v43, %v675_v13 }
  0xb1   :  { %v679_v59 = vmul.f32 0.02, %v451_v61  ;;  %vm647_vm6 = vcmp.gt.f32.partialorder %v451_v61, 0.0 }
  0xb2   :  { %v534_v51 = vpop.f32.mrf.mxu0  ;;  %v710_v38 = vsel %vm646_vm14, %v422_v33, %v678_v19 }
  0xb3   :  { %v566_v8 = vpop.f32.mrf.mxu1  ;;  %v2241_v9 = vsel %vm647_vm6, %v451_v61, %v679_v59  ;;  %v535_v21 = vadd.f32 %v534_v51, %v2217_v30  ;;  %v2279_v61 = vld [vmem:[%s2768_s1 + $0x40] sm:$0xff]  ;;  %v2292_v59 = vld [vmem:[%s2768_s1 + $0x50] sm:$0xff] }
  0xb4   :  { %v567_v26 = vadd.f32 %v566_v8, %v2219_v49 }
  0xb5   :  { %v424_v54 = vpop.f32.mrf.mxu2  ;;  %v674_v35 = vmul.f32 0.02, %v535_v21  ;;  %vm642_vm3 = vcmp.gt.f32.partialorder %v535_v21, 0.0 }
  0xb6   :  { %v453_v5 = vpop.f32.mrf.mxu3  ;;  %v425_v2 = vadd.f32 %v424_v54, %v2213_v42  ;;  %v683_v3 = vmul.f32 0.02, %v567_v26  ;;  %vm651_vm8 = vcmp.gt.f32.partialorder %v567_v26, 0.0 }
  0xb7   :  { %v454_v57 = vadd.f32 %v453_v5, %v2213_v42  ;;  %v706_v46 = vsel %vm642_vm3, %v535_v21, %v674_v35 }
  0xb8   :  { %v686_v52 = vmul.f32 0.02, %v425_v2  ;;  %vm654_vm12 = vcmp.gt.f32.partialorder %v425_v2, 0.0  ;;  %v2253_v17 = vsel %vm651_vm8, %v567_v26, %v683_v3 }
  0xb9   :  { %vm655_vm5 = vcmp.gt.f32.partialorder %v454_v57, 0.0  ;;  %v687_v0 = vmul.f32 0.02, %v454_v57 }
  0xba   :  { %v537_v60 = vpop.f32.mrf.mxu0  ;;  %v718_v24 = vsel %vm654_vm12, %v425_v2, %v686_v52 }
  0xbb   :  { %v2234_v63 = vsel %vm655_vm5, %v454_v57, %v687_v0  ;;  %v569_v55 = vpop.f32.mrf.mxu1  ;;  %v538_v12 = vadd.f32 %v537_v60, %v2219_v49  ;;  %vm750_vm5 = vcmask 785408  }
  0xbc   :  { %763 = vmatpush.msrb.mxu0 %v2234_v63  ;;  %v570_v4 = vadd.f32 %v569_v55, %v2213_v42 }
  0xbd   :  { %v2239_v7 = vpop.f32.mrf.mxu2  ;;  %v682_v32 = vmul.f32 0.02, %v538_v12  ;;  %vm650_vm1 = vcmp.gt.f32.partialorder %v538_v12, 0.0 }
  0xbe   :  { %v2243_v10 = vpop.f32.mrf.mxu3  ;;  %764 = vmatpush.msrb.mxu0 %v2241_v9  ;;  %vm659_vm10 = vcmp.gt.f32.partialorder %v570_v4, 0.0  ;;  %v691_v14 = vmul.f32 0.02, %v570_v4  ;;  %v474_v13 = vadd.f32 %v2239_v7, %v2221_v53 }
  0xbf   :  { %v714_v41 = vsel %vm650_vm1, %v538_v12, %v682_v32  ;;  %v503_v26 = vadd.f32 %v2243_v10, %v2221_v53  ;;  %v1714_v32 = vmov 96  }
  0xc0   :  { %765 = vmatpush.msrb.mxu0 %v2247_v15  ;;  %v2251_v16 = vsel %vm659_vm10, %v570_v4, %v691_v14  ;;  %v664_v21 = vmul.f32 0.02, %v474_v13  ;;  %vm632_vm13 = vcmp.gt.f32.partialorder %v474_v13, 0.0  ;;  %1708 = vset.pattern.permute.xlu1 %v1714_v32 }
  0xc1   :  { %821 = vmatpush.msrb.mxu2 %v2251_v16  ;;  %v665_v3 = vmul.f32 0.02, %v503_v26  ;;  %vm633_vm9 = vcmp.gt.f32.partialorder %v503_v26, 0.0  ;;  %1707 = vset.pattern.permute.xlu0 %v1714_v32 }
  0xc2   :  { %766 = vmatpush.msrb.mxu0 %v2255_v18  ;;  %v540_v22 = vpop.f32.mrf.mxu0  ;;  %v696_v27 = vsel %vm632_vm13, %v474_v13, %v664_v21  ;;  %732 = vperm.xlu1 %1708, %v2279_v61  }
  0xc3   :  { %v541_v1 = vadd.f32 %v540_v22, %v2213_v42  ;;  %822 = vmatpush.msrb.mxu2 %v2253_v17  ;;  %v697_v10 = vsel %vm633_vm9, %v503_v26, %v665_v3  ;;  %737 = vperm.xlu0 %1707, %v2292_v59  }
  0xc4   :  { %767 = vmatpush.msrb.mxu0 %v718_v24  ;;  %1706 = vset.pattern.permute.xlu2 %v1714_v32 }
  0xc5   :  { %v476_v37 = vpop.f32.mrf.mxu2  ;;  %v690_v47 = vmul.f32 0.02, %v541_v1  ;;  %823 = vmatpush.msrb.mxu2 %v2260_v23  ;;  %vm658_vm0 = vcmp.gt.f32.partialorder %v541_v1, 0.0  ;;  %747 = vperm.xlu2 %1706, %v2315_v28  }
  0xc6   :  { %v505_v36 = vpop.f32.mrf.mxu3  ;;  %768 = vmatpush.msrb.mxu0 %v710_v38  ;;  %v477_v4 = vadd.f32 %v476_v37, %v2217_v30 }
  0xc7   :  { %824 = vmatpush.msrb.mxu2 %v2267_v34  ;;  %v722_v40 = vsel %vm658_vm0, %v541_v1, %v690_v47  ;;  %v506_v57 = vadd.f32 %v505_v36, %v2217_v30 }
  0xc8   :  { %769 = vmatpush.msrb.mxu0 %v702_v39  ;;  %v672_v12 = vmul.f32 0.02, %v477_v4  ;;  %vm640_vm12 = vcmp.gt.f32.partialorder %v477_v4, 0.0 }
  0xc9   :  { %825 = vmatpush.msrb.mxu2 %v722_v40  ;;  %v673_v62 = vmul.f32 0.02, %v506_v57  ;;  %vm641_vm8 = vcmp.gt.f32.partialorder %v506_v57, 0.0 }
  0xca   :  { %770 = vmatpush.msrb.mxu0 %v694_v44  ;;  %v704_v24 = vsel %vm640_vm12, %v477_v4, %v672_v12  ;;  %963 = vperm.xlu1 %1708, %v2345_v20  }
  0xcb   :  { %826 = vmatpush.msrb.mxu2 %v714_v41  ;;  %v705_v33 = vsel %vm641_vm8, %v506_v57, %v673_v62  ;;  %v2362_v57 = vld [vmem:[%s2768_s1 + $0xb0] sm:$0xff] }
  0xcc   :  { %771 = vmatpush.msrb.mxu0 %v1713_v45  ;;  %v2392_v62 = vld [vmem:[%s2768_s1 + $0xd0] sm:$0xff] }
  0xcd   :  { %v479_v51 = vpop.f32.mrf.mxu2  ;;  %827 = vmatpush.msrb.mxu2 %v706_v46  ;;  %742 = vperm.xlu2 %1706, %v2306_v50  }
  0xce   :  { %v508_v8 = vpop.f32.mrf.mxu3  ;;  %772 = vmatpush.msrb.mxu0 %v1713_v45  ;;  %v480_v2 = vadd.f32 %v479_v51, %v2219_v49 }
  0xcf   :  { %828 = vmatpush.msrb.mxu2 %v698_v48  ;;  %v509_v54 = vadd.f32 %v508_v8, %v2219_v49 }
  0xd0   :  { %773 = vmatpush.msrb.mxu0 %v1713_v45  ;;  %v680_v14 = vmul.f32 0.02, %v480_v2  ;;  %vm648_vm11 = vcmp.gt.f32.partialorder %v480_v2, 0.0 }
  0xd1   :  { %v681_v0 = vmul.f32 0.02, %v509_v54  ;;  %vm649_vm7 = vcmp.gt.f32.partialorder %v509_v54, 0.0 }
  0xd2   :  { %774 = vmatpush.msrb.mxu0 %v1713_v45  ;;  %v712_v19 = vsel %vm648_vm11, %v480_v2, %v680_v14  ;;  %948 = vperm.xlu1 %1708, %v2362_v57  }
  0xd3   :  { %1644 = vmatmul.msk.f32.vlgmr.msrb.gmra.mxu0 %vm750_vm5, %v2279_v61  ;;  %v713_v55 = vsel %vm649_vm7, %v509_v54, %v681_v0  ;;  %v2371_v0 = vld [vmem:[%s2768_s1 + $0xf0] sm:$0xff] }
  0xd5   :  { %v482_v5 = vpop.f32.mrf.mxu2  ;;  %968 = vperm.xlu2 %1706, %v2371_v0  }
  0xd6   :  { %v511_v56 = vpop.f32.mrf.mxu3  ;;  %v483_v43 = vadd.f32 %v482_v5, %v2213_v42 }
  0xd7   :  { %v512_v58 = vadd.f32 %v511_v56, %v2213_v42 }
  0xd8   :  { %v688_v6 = vmul.f32 0.02, %v483_v43  ;;  %vm656_vm10 = vcmp.gt.f32.partialorder %v483_v43, 0.0 }
  0xd9   :  { %vm657_vm6 = vcmp.gt.f32.partialorder %v512_v58, 0.0  ;;  %v689_v29 = vmul.f32 0.02, %v512_v58 }
  0xda   :  { %v720_v52 = vsel %vm656_vm10, %v483_v43, %v688_v6  ;;  %v2376_v43 = vld [vmem:[%s2768_s1 + $0x90] sm:$0xff] }
  0xdb   :  { %v721_v60 = vsel %vm657_vm6, %v512_v58, %v689_v29  ;;  %1645 = vmatmul.msk.f32.gmra.mxu0 %vm750_vm5, %v2292_v59 }
  0xdc   :  { %792 = vmatpush.msrb.mxu1 %v721_v60  ;;  %829 = vmatpush.msrb.mxu2 %v721_v60  ;;  %v2381_v60 = vld [vmem:[%s2768_s1 + $0x80] sm:$0xff] }
  0xdd   :  { %v2298_v25 = vpop.f32.mrf.mxu2  ;;  %933 = vperm.xlu1 %1708, %v2381_v60   ;;  %958 = vperm.xlu2 %1706, %v2392_v62  }
  0xde   :  { %v618_v11 = vpop.f32.mrf.mxu3  ;;  %793 = vmatpush.msrb.mxu1 %v713_v55  ;;  %830 = vmatpush.msrb.mxu2 %v713_v55  ;;  %v590_v8 = vadd.f32 %v2298_v25, %v2221_v53 }
  0xdf   :  { %v619_v47 = vadd.f32 %v618_v11, %v2221_v53 }
  0xe0   :  { %794 = vmatpush.msrb.mxu1 %v705_v33  ;;  %831 = vmatpush.msrb.mxu2 %v705_v33  ;;  %v668_v53 = vmul.f32 0.02, %v590_v8  ;;  %vm636_vm6 = vcmp.gt.f32.partialorder %v590_v8, 0.0 }
  0xe1   :  { %v669_v41 = vmul.f32 0.02, %v619_v47  ;;  %vm637_vm1 = vcmp.gt.f32.partialorder %v619_v47, 0.0 }
  0xe2   :  { %795 = vmatpush.msrb.mxu1 %v697_v10  ;;  %832 = vmatpush.msrb.mxu2 %v697_v10  ;;  %v700_v29 = vsel %vm636_vm6, %v590_v8, %v668_v53 }
  0xe3   :  { %1652 = vmatmul.msk.f32.vlgmr.msrb.gmra.mxu2 %vm750_vm5, %v2279_v61  ;;  %1646 = vmatmul.msk.f32.gmra.mxu0 %vm750_vm5, %v2306_v50  ;;  %v701_v5 = vsel %vm637_vm1, %v619_v47, %v669_v41 }
  0xe4   :  { %796 = vmatpush.msrb.mxu1 %v720_v52 }
  0xe5   :  { %v592_v7 = vpop.f32.mrf.mxu2 }
  0xe6   :  { %v621_v22 = vpop.f32.mrf.mxu3  ;;  %797 = vmatpush.msrb.mxu1 %v712_v19  ;;  %v593_v46 = vadd.f32 %v592_v7, %v2217_v30 }
  0xe8   :  { %798 = vmatpush.msrb.mxu1 %v704_v24  ;;  %v676_v56 = vmul.f32 0.02, %v593_v46  ;;  %vm644_vm4 = vcmp.gt.f32.partialorder %v593_v46, 0.0 }
  0xea   :  { %799 = vmatpush.msrb.mxu1 %v696_v27  ;;  %v708_v26 = vsel %vm644_vm4, %v593_v46, %v676_v56 }
  0xeb   :  { %1653 = vmatmul.msk.f32.gmra.mxu2 %vm750_vm5, %v2292_v59  ;;  %1647 = vmatmul.msk.f32.gmra.mxu0 %vm750_vm5, %v2315_v28 }
  0xec   :  { %800 = vmatpush.msrb.mxu1 %v2234_v63 }
  0xed   :  { %v595_v1 = vpop.f32.mrf.mxu2 }
  0xee   :  { %v624_v31 = vpop.f32.mrf.mxu3  ;;  %801 = vmatpush.msrb.mxu1 %v2241_v9  ;;  %v596_v44 = vadd.f32 %v595_v1, %v2219_v49 }
  0xef   :  { %v625_v63 = vadd.f32 %v624_v31, %v2219_v49 }
  0xf0   :  { %802 = vmatpush.msrb.mxu1 %v2247_v15  ;;  %v622_v15 = vadd.f32 %v621_v22, %v2217_v30  ;;  %v684_v54 = vmul.f32 0.02, %v596_v44  ;;  %vm652_vm3 = vcmp.gt.f32.partialorder %v596_v44, 0.0  ;;  %v2357_v30 = vld [vmem:[%s2768_s1 + $0xc0] sm:$0xff] }
  0xf1   :  { %v685_v35 = vmul.f32 0.02, %v625_v63  ;;  %vm653_vm15 = vcmp.gt.f32.partialorder %v625_v63, 0.0  ;;  %953 = vperm.xlu0 %1707, %v2357_v30  }
  0xf2   :  { %803 = vmatpush.msrb.mxu1 %v2255_v18  ;;  %v677_v36 = vmul.f32 0.02, %v622_v15  ;;  %vm645_vm0 = vcmp.gt.f32.partialorder %v622_v15, 0.0  ;;  %v716_v58 = vsel %vm652_vm3, %v596_v44, %v684_v54 }
  0xf3   :  { %1648 = vmatmul.msk.f32.vlgmr.msrb.gmra.mxu1 %vm750_vm5, %v2279_v61  ;;  %1654 = vmatmul.msk.f32.gmra.mxu2 %vm750_vm5, %v2306_v50 }
  0xf4   :  { %v709_v51 = vsel %vm645_vm0, %v622_v15, %v677_v36 }
  0xf5   :  { %v598_v38 = vpop.f32.mrf.mxu2 }
  0xf6   :  { %v627_v9 = vpop.f32.mrf.mxu3  ;;  %v599_v39 = vadd.f32 %v598_v38, %v2213_v42 }
  0xf7   :  { %v628_v37 = vadd.f32 %v627_v9, %v2213_v42  ;;  %v717_v42 = vsel %vm653_vm15, %v625_v63, %v685_v35 }
  0xf8   :  { %v692_v48 = vmul.f32 0.02, %v599_v39  ;;  %vm660_vm2 = vcmp.gt.f32.partialorder %v599_v39, 0.0 }
  0xf9   :  { %vm661_vm14 = vcmp.gt.f32.partialorder %v628_v37, 0.0  ;;  %v693_v18 = vmul.f32 0.02, %v628_v37  ;;  %938 = vperm.xlu0 %1707, %v2376_v43  }
  0xfa   :  { %v724_v49 = vsel %vm660_vm2, %v599_v39, %v692_v48 }
  0xfb   :  { %1649 = vmatmul.msk.f32.gmra.mxu1 %vm750_vm5, %v2292_v59  ;;  %v725_v40 = vsel %vm661_vm14, %v628_v37, %v693_v18  ;;  %1655 = vmatmul.msk.f32.gmra.mxu2 %vm750_vm5, %v2315_v28 }
  0xfc   :  { %850 = vmatpush.msrb.mxu3 %v725_v40 }
  0xfe   :  { %851 = vmatpush.msrb.mxu3 %v717_v42 }
 0x100   :  { %852 = vmatpush.msrb.mxu3 %v709_v51 }
 0x102   :  { %853 = vmatpush.msrb.mxu3 %v701_v5 }
 0x103   :  { %1650 = vmatmul.msk.f32.gmra.mxu1 %vm750_vm5, %v2306_v50 }
 0x104   :  { %854 = vmatpush.msrb.mxu3 %v724_v49 }
 0x106   :  { %855 = vmatpush.msrb.mxu3 %v716_v58 }
 0x108   :  { %856 = vmatpush.msrb.mxu3 %v708_v26 }
 0x10a   :  { %857 = vmatpush.msrb.mxu3 %v700_v29 }
 0x10b   :  { %1651 = vmatmul.msk.f32.gmra.mxu1 %vm750_vm5, %v2315_v28 }
 0x10c   :  { %858 = vmatpush.msrb.mxu3 %v2251_v16  ;;  %v2401_v16 = vld [vmem:[%s2768_s1 + $0xa0] sm:$0xff] }
 0x10d   :  { %943 = vperm.xlu2 %1706, %v2401_v16  }
 0x10e   :  { %859 = vmatpush.msrb.mxu3 %v2253_v17 }
 0x110   :  { %860 = vmatpush.msrb.mxu3 %v2260_v23 }
 0x112   :  { %861 = vmatpush.msrb.mxu3 %v2267_v34 }
 0x113   :  { %1656 = vmatmul.msk.f32.vlgmr.msrb.gmra.mxu3 %vm750_vm5, %v2279_v61 }
 0x11b   :  { %1657 = vmatmul.msk.f32.gmra.mxu3 %vm750_vm5, %v2292_v59 }
 0x11f   :  { %v2410_v2 = vpop.permute.xlu2 %747 }
 0x123   :  { %1658 = vmatmul.msk.f32.gmra.mxu3 %vm750_vm5, %v2306_v50 }
 0x127   :  { %v2412_v3 = vpop.permute.xlu2 %742 }
 0x12b   :  { %1659 = vmatmul.msk.f32.gmra.mxu3 %vm750_vm5, %v2315_v28 }
 0x134   :  { %v2417_v4 = vpop.permute.xlu1 %732 }
 0x135   :  { %v2415_v11 = vpop.permute.xlu0 %737 }
 0x150   :  { %v776_v17 = vpop.f32.mrf.mxu0 }
 0x151   :  { %v777_v63 = vadd.f32 %v776_v17, %v2417_v4 }
 0x153   :  { %v891_v35 = vmul.f32 0.02, %v777_v63  ;;  %vm875_vm14 = vcmp.gt.f32.partialorder %v777_v63, 0.0 }
 0x155   :  { %v907_v36 = vsel %vm875_vm14, %v777_v63, %v891_v35 }
 0x158   :  { %v779_v34 = vpop.f32.mrf.mxu0 }
 0x159   :  { %v780_v1 = vadd.f32 %v779_v34, %v2415_v11 }
 0x15b   :  { %v895_v38 = vmul.f32 0.02, %v780_v1  ;;  %vm879_vm13 = vcmp.gt.f32.partialorder %v780_v1, 0.0 }
 0x15d   :  { %v911_v18 = vsel %vm879_vm13, %v780_v1, %v895_v38 }
 0x160   :  { %v782_v25 = vpop.f32.mrf.mxu0 }
 0x161   :  { %v783_v7 = vadd.f32 %v782_v25, %v2412_v3 }
 0x163   :  { %v899_v28 = vmul.f32 0.02, %v783_v7  ;;  %vm883_vm12 = vcmp.gt.f32.partialorder %v783_v7, 0.0 }
 0x165   :  { %v915_v37 = vsel %vm883_vm12, %v783_v7, %v899_v28 }
 0x166   :  { %v834_v32 = vpop.f32.mrf.mxu2 }
 0x168   :  { %v785_v6 = vpop.f32.mrf.mxu0 }
 0x169   :  { %v786_v12 = vadd.f32 %v785_v6, %v2410_v2 }
 0x16b   :  { %v903_v24 = vmul.f32 0.02, %v786_v12  ;;  %vm887_vm11 = vcmp.gt.f32.partialorder %v786_v12, 0.0 }
 0x16d   :  { %v919_v15 = vsel %vm887_vm11, %v786_v12, %v903_v24 }
 0x16e   :  { %v837_v39 = vpop.f32.mrf.mxu2 }
 0x170   :  { %v805_v23 = vpop.f32.mrf.mxu1 }
 0x171   :  { %v806_v50 = vadd.f32 %v805_v23, %v2417_v4  ;;  %v838_v23 = vadd.f32 %v837_v39, %v2415_v11 }
 0x173   :  { %v892_v27 = vmul.f32 0.02, %v806_v50  ;;  %vm876_vm10 = vcmp.gt.f32.partialorder %v806_v50, 0.0  ;;  %vm881_vm6 = vcmp.gt.f32.partialorder %v838_v23, 0.0 }
 0x175   :  { %v2435_v9 = vsel %vm876_vm10, %v806_v50, %v892_v27  ;;  %v2488_v50 = vpop.permute.xlu2 %968 }
 0x176   :  { %v840_v41 = vpop.f32.mrf.mxu2 }
 0x177   :  { %v841_v26 = vadd.f32 %v840_v41, %v2412_v3 }
 0x178   :  { %v808_v61 = vpop.f32.mrf.mxu1 }
 0x179   :  { %v809_v14 = vadd.f32 %v808_v61, %v2415_v11  ;;  %v901_v25 = vmul.f32 0.02, %v841_v26  ;;  %vm885_vm4 = vcmp.gt.f32.partialorder %v841_v26, 0.0 }
 0x17b   :  { %v896_v22 = vmul.f32 0.02, %v809_v14  ;;  %vm880_vm9 = vcmp.gt.f32.partialorder %v809_v14, 0.0 }
 0x17d   :  { %v2431_v31 = vsel %vm880_vm9, %v809_v14, %v896_v22  ;;  %v2494_v12 = vpop.permute.xlu2 %958 }
 0x17e   :  { %v843_v8 = vpop.f32.mrf.mxu2 }
 0x17f   :  { %v844_v49 = vadd.f32 %v843_v8, %v2410_v2 }
 0x180   :  { %v811_v55 = vpop.f32.mrf.mxu1 }
 0x181   :  { %v812_v59 = vadd.f32 %v811_v55, %v2412_v3  ;;  %v905_v34 = vmul.f32 0.02, %v844_v49  ;;  %vm889_vm3 = vcmp.gt.f32.partialorder %v844_v49, 0.0 }
 0x183   :  { %v900_v13 = vmul.f32 0.02, %v812_v59  ;;  %vm884_vm7 = vcmp.gt.f32.partialorder %v812_v59, 0.0 }
 0x185   :  { %v2426_v21 = vsel %vm884_vm7, %v812_v59, %v900_v13  ;;  %v897_v59 = vmul.f32 0.02, %v838_v23 }
 0x188   :  { %v814_v33 = vpop.f32.mrf.mxu1 }
 0x189   :  { %v815_v10 = vadd.f32 %v814_v33, %v2410_v2  ;;  %v917_v33 = vsel %vm885_vm4, %v841_v26, %v901_v25 }
 0x18b   :  { %vm888_vm8 = vcmp.gt.f32.partialorder %v815_v10, 0.0  ;;  %v904_v52 = vmul.f32 0.02, %v815_v10 }
 0x18d   :  { %v2424_v19 = vsel %vm888_vm8, %v815_v10, %v904_v52 }
 0x18e   :  { %991 = vmatpush.msra.mxu0 %v2424_v19 }
 0x190   :  { %992 = vmatpush.msra.mxu0 %v2426_v21 }
 0x192   :  { %993 = vmatpush.msra.mxu0 %v2431_v31 }
 0x194   :  { %994 = vmatpush.msra.mxu0 %v2435_v9 }
 0x196   :  { %v863_v47 = vpop.f32.mrf.mxu3  ;;  %995 = vmatpush.msra.mxu0 %v919_v15 }
 0x197   :  { %v864_v54 = vadd.f32 %v863_v47, %v2417_v4 }
 0x198   :  { %996 = vmatpush.msra.mxu0 %v915_v37 }
 0x199   :  { %v894_v29 = vmul.f32 0.02, %v864_v54  ;;  %vm878_vm2 = vcmp.gt.f32.partialorder %v864_v54, 0.0 }
 0x19a   :  { %997 = vmatpush.msra.mxu0 %v911_v18 }
 0x19b   :  { %v910_v55 = vsel %vm878_vm2, %v864_v54, %v894_v29  ;;  %v2532_v29 = vld [vmem:[%s2768_s1 + $0x138] sm:$0xff] }
 0x19c   :  { %998 = vmatpush.msra.mxu0 %v907_v36 }
 0x19e   :  { %v866_v40 = vpop.f32.mrf.mxu3  ;;  %999 = vmatpush.msra.mxu0 %v1713_v45 }
 0x19f   :  { %v867_v48 = vadd.f32 %v866_v40, %v2415_v11  ;;  %v913_v11 = vsel %vm881_vm6, %v838_v23, %v897_v59  ;;  %v2543_v23 = vld [vmem:[%s2768_s1 + $0x168] sm:$0xff] }
 0x1a0   :  { %1000 = vmatpush.msra.mxu0 %v1713_v45 }
 0x1a1   :  { %v898_v53 = vmul.f32 0.02, %v867_v48  ;;  %vm882_vm1 = vcmp.gt.f32.partialorder %v867_v48, 0.0 }
 0x1a2   :  { %1001 = vmatpush.msra.mxu0 %v1713_v45 }
 0x1a3   :  { %v914_v61 = vsel %vm882_vm1, %v867_v48, %v898_v53  ;;  %v2523_v53 = vld [vmem:[%s2768_s1 + $0x158] sm:$0xff] }
 0x1a4   :  { %1002 = vmatpush.msra.mxu0 %v1713_v45 }
 0x1a5   :  { %1660 = vmatmul.msk.f32.vlgmr.msra.gmra.mxu0 %vm750_vm5, %v2381_v60 }
 0x1a6   :  { %v869_v44 = vpop.f32.mrf.mxu3 }
 0x1a7   :  { %v870_v42 = vadd.f32 %v869_v44, %v2412_v3  ;;  %v921_v3 = vsel %vm889_vm3, %v844_v49, %v905_v34 }
 0x1a9   :  { %v902_v5 = vmul.f32 0.02, %v870_v42  ;;  %vm886_vm0 = vcmp.gt.f32.partialorder %v870_v42, 0.0 }
 0x1ab   :  { %v918_v17 = vsel %vm886_vm0, %v870_v42, %v902_v5 }
 0x1ad   :  { %1661 = vmatmul.msk.f32.gmra.mxu0 %vm750_vm5, %v2376_v43 }
 0x1ae   :  { %v872_v46 = vpop.f32.mrf.mxu3 }
 0x1af   :  { %v873_v51 = vadd.f32 %v872_v46, %v2410_v2  ;;  %v835_v2 = vadd.f32 %v834_v32, %v2417_v4 }
 0x1b1   :  { %vm890_vm15 = vcmp.gt.f32.partialorder %v873_v51, 0.0  ;;  %v906_v56 = vmul.f32 0.02, %v873_v51  ;;  %v893_v6 = vmul.f32 0.02, %v835_v2  ;;  %vm877_vm7 = vcmp.gt.f32.partialorder %v835_v2, 0.0 }
 0x1b3   :  { %v922_v58 = vsel %vm890_vm15, %v873_v51, %v906_v56  ;;  %v909_v13 = vsel %vm877_vm7, %v835_v2, %v893_v6 }
 0x1b4   :  { %1032 = vmatpush.msra.mxu1 %v922_v58  ;;  %v1715_v58 = vmov 64  }
 0x1b5   :  { %1662 = vmatmul.msk.f32.gmra.mxu0 %vm750_vm5, %v2401_v16  ;;  %1711 = vset.pattern.permute.xlu1 %v1715_v58 }
 0x1b6   :  { %1033 = vmatpush.msra.mxu1 %v918_v17  ;;  %1710 = vset.pattern.permute.xlu0 %v1715_v58  ;;  %v1117_v17 = vld [vmem:[%s2768_s1 + $0x100] sm:$0xff] }
 0x1b7   :  { %1160 = vperm.xlu1 %1711, %v2523_v53   ;;  %1709 = vset.pattern.permute.xlu2 %v1715_v58 }
 0x1b8   :  { %1034 = vmatpush.msra.mxu1 %v914_v61  ;;  %1165 = vperm.xlu0 %1710, %v2543_v23  }
 0x1ba   :  { %1035 = vmatpush.msra.mxu1 %v910_v55 }
 0x1bc   :  { %1036 = vmatpush.msra.mxu1 %v921_v3 }
 0x1bd   :  { %1663 = vmatmul.msk.f32.gmra.mxu0 %vm750_vm5, %v2362_v57 }
 0x1be   :  { %1037 = vmatpush.msra.mxu1 %v917_v33  ;;  %v1118_v33 = vld [vmem:[%s2768_s1 + $0x108] sm:$0xff] }
 0x1bf   :  { %1150 = vperm.xlu1 %1711, %v2532_v29  }
 0x1c0   :  { %1038 = vmatpush.msra.mxu1 %v913_v11 }
 0x1c2   :  { %1039 = vmatpush.msra.mxu1 %v909_v13 }
 0x1c4   :  { %1040 = vmatpush.msra.mxu1 %v2424_v19 }
 0x1c5   :  { %1664 = vmatmul.msk.f32.gmra.mxu0 %vm750_vm5, %v2357_v30 }
 0x1c6   :  { %1041 = vmatpush.msra.mxu1 %v2426_v21 }
 0x1c7   :  { %1135 = vperm.xlu1 %1711, %v1118_v33  }
 0x1c8   :  { %1042 = vmatpush.msra.mxu1 %v2431_v31 }
 0x1ca   :  { %1043 = vmatpush.msra.mxu1 %v2435_v9  ;;  %v2507_v9 = vpop.permute.xlu2 %943 }
 0x1cb   :  { %1668 = vmatmul.msk.f32.vlgmr.msra.gmra.mxu1 %vm750_vm5, %v2381_v60 }
 0x1cd   :  { %1665 = vmatmul.msk.f32.gmra.mxu0 %vm750_vm5, %v2392_v62 }
 0x1d3   :  { %1669 = vmatmul.msk.f32.gmra.mxu1 %vm750_vm5, %v2376_v43 }
 0x1d5   :  { %1666 = vmatmul.msk.f32.gmra.mxu0 %vm750_vm5, %v2345_v20 }
 0x1db   :  { %1670 = vmatmul.msk.f32.gmra.mxu1 %vm750_vm5, %v2401_v16 }
 0x1dd   :  { %1667 = vmatmul.msk.f32.gmra.mxu0 %vm750_vm5, %v2371_v0 }
 0x1e3   :  { %1671 = vmatmul.msk.f32.gmra.mxu1 %vm750_vm5, %v2362_v57 }
 0x1eb   :  { %1672 = vmatmul.msk.f32.gmra.mxu1 %vm750_vm5, %v2357_v30  ;;  %v2490_v30 = vpop.permute.xlu1 %963 }
 0x1f3   :  { %1673 = vmatmul.msk.f32.gmra.mxu1 %vm750_vm5, %v2392_v62  ;;  %v2501_v19 = vpop.permute.xlu1 %948 }
 0x1fb   :  { %1674 = vmatmul.msk.f32.gmra.mxu1 %vm750_vm5, %v2345_v20  ;;  %v2496_v20 = vpop.permute.xlu0 %953  ;;  %v2515_v40 = vpop.permute.xlu1 %933 }
 0x203   :  { %1675 = vmatmul.msk.f32.gmra.mxu1 %vm750_vm5, %v2371_v0  ;;  %v2512_v35 = vpop.permute.xlu0 %938 }
 0x222   :  { %v1004_v43 = vpop.f32.mrf.mxu0 }
 0x223   :  { %v1005_v41 = vadd.f32 %v1004_v43, %v2515_v40  ;;  %v1120_v43 = vld [vmem:[%s2768_s1 + $0x118] sm:$0xff] }
 0x224   :  { %1140 = vperm.xlu0 %1710, %v1120_v43  }
 0x225   :  { %v1085_v8 = vmul.f32 0.02, %v1005_v41  ;;  %vm1069_vm14 = vcmp.gt.f32.partialorder %v1005_v41, 0.0 }
 0x227   :  { %v1101_v56 = vsel %vm1069_vm14, %v1005_v41, %v1085_v8  ;;  %v1131_v41 = vld [vmem:[%s2768_s1 + $0x170] sm:$0xff] }
 0x229   :  { %v1161_v8 = vpop.permute.xlu1 %1160 }
 0x22a   :  { %v1007_v60 = vpop.f32.mrf.mxu0 }
 0x22b   :  { %v1008_v18 = vadd.f32 %v1007_v60, %v2512_v35 }
 0x22d   :  { %v1087_v46 = vmul.f32 0.02, %v1008_v18  ;;  %vm1071_vm13 = vcmp.gt.f32.partialorder %v1008_v18, 0.0 }
 0x22f   :  { %v1103_v5 = vsel %vm1071_vm13, %v1008_v18, %v1087_v46  ;;  %v2644_v18 = vld [vmem:[%s2768_s1 + $0x180] sm:$0xff]  ;;  %v2684_v46 = vld [vmem:[%s2768_s1 + $0x250] sm:$0xff] }
 0x232   :  { %v1010_v16 = vpop.f32.mrf.mxu0 }
 0x233   :  { %v1011_v37 = vadd.f32 %v1010_v16, %v2507_v9 }
 0x235   :  { %v1089_v44 = vmul.f32 0.02, %v1011_v37  ;;  %vm1073_vm12 = vcmp.gt.f32.partialorder %v1011_v37, 0.0 }
 0x237   :  { %v1105_v54 = vsel %vm1073_vm12, %v1011_v37, %v1089_v44  ;;  %v2621_v37 = vld [vmem:[%s2768_s1 + $0x1b0] sm:$0xff]  ;;  %v2670_v44 = vld [vmem:[%s2768_s1 + $0x260] sm:$0xff] }
 0x23a   :  { %v1013_v4 = vpop.f32.mrf.mxu0 }
 0x23b   :  { %v1014_v31 = vadd.f32 %v1013_v4, %v2501_v19 }
 0x23d   :  { %v1091_v36 = vmul.f32 0.02, %v1014_v31  ;;  %vm1075_vm11 = vcmp.gt.f32.partialorder %v1014_v31, 0.0 }
 0x23f   :  { %v1107_v48 = vsel %vm1075_vm11, %v1014_v31, %v1091_v36  ;;  %v1122_v31 = vld [vmem:[%s2768_s1 + $0x128] sm:$0xff]  ;;  %v2649_v36 = vld [vmem:[%s2768_s1 + $0x230] sm:$0xff] }
 0x242   :  { %v1016_v10 = vpop.f32.mrf.mxu0 }
 0x243   :  { %v1017_v27 = vadd.f32 %v1016_v10, %v2496_v20 }
 0x245   :  { %v1093_v38 = vmul.f32 0.02, %v1017_v27  ;;  %vm1077_vm10 = vcmp.gt.f32.partialorder %v1017_v27, 0.0 }
 0x247   :  { %v1109_v42 = vsel %vm1077_vm10, %v1017_v27, %v1093_v38  ;;  %v1123_v27 = vld [vmem:[%s2768_s1 + $0x130] sm:$0xff]  ;;  %v2626_v38 = vld [vmem:[%s2768_s1 + $0x200] sm:$0xff] }
 0x248   :  { %v2486_v14 = vpop.f32.mrf.mxu1 }
 0x24a   :  { %v1019_v57 = vpop.f32.mrf.mxu0 }
 0x24b   :  { %v1020_v22 = vadd.f32 %v1019_v57, %v2494_v12 }
 0x24d   :  { %v1095_v32 = vmul.f32 0.02, %v1020_v22  ;;  %vm1079_vm9 = vcmp.gt.f32.partialorder %v1020_v22, 0.0 }
 0x24f   :  { %v1111_v39 = vsel %vm1079_vm9, %v1020_v22, %v1095_v32  ;;  %v2600_v32 = vld [vmem:[%s2768_s1 + $0x1e0] sm:$0xff] }
 0x250   :  { %v2492_v52 = vpop.f32.mrf.mxu1  ;;  %1336 = vperm.xlu0 %1710, %v2600_v32  }
 0x251   :  { %v1049_v10 = vadd.f32 %v2492_v52, %v2512_v35  ;;  %v2574_v52 = vld [vmem:[%s2768_s1 + $0x178] sm:$0xff]  ;;  %v2639_v35 = vld [vmem:[%s2768_s1 + $0x1c0] sm:$0xff] }
 0x252   :  { %v1022_v62 = vpop.f32.mrf.mxu0  ;;  %1170 = vperm.xlu2 %1709, %v2574_v52  }
 0x253   :  { %v1023_v7 = vadd.f32 %v1022_v62, %v2490_v30  ;;  %vm1072_vm6 = vcmp.gt.f32.partialorder %v1049_v10, 0.0 }
 0x255   :  { %v1097_v28 = vmul.f32 0.02, %v1023_v7  ;;  %vm1081_vm8 = vcmp.gt.f32.partialorder %v1023_v7, 0.0 }
 0x257   :  { %v1113_v47 = vsel %vm1081_vm8, %v1023_v7, %v1097_v28  ;;  %v2587_v28 = vld [vmem:[%s2768_s1 + $0x1d0] sm:$0xff] }
 0x258   :  { %v2498_v0 = vpop.f32.mrf.mxu1  ;;  %1331 = vperm.xlu1 %1711, %v2587_v28   ;;  %1321 = vperm.xlu0 %1710, %v2621_v37  }
 0x259   :  { %v1052_v60 = vadd.f32 %v2498_v0, %v2507_v9  ;;  %v1088_v0 = vmul.f32 0.02, %v1049_v10  ;;  %v1127_v9 = vld [vmem:[%s2768_s1 + $0x150] sm:$0xff] }
 0x25a   :  { %v1025_v21 = vpop.f32.mrf.mxu0 }
 0x25b   :  { %v1026_v24 = vadd.f32 %v1025_v21, %v2488_v50  ;;  %v1090_v62 = vmul.f32 0.02, %v1052_v60  ;;  %vm1074_vm4 = vcmp.gt.f32.partialorder %v1052_v60, 0.0  ;;  %v1104_v21 = vsel %vm1072_vm6, %v1049_v10, %v1088_v0 }
 0x25d   :  { %vm1083_vm5 = vcmp.gt.f32.partialorder %v1026_v24, 0.0  ;;  %v1099_v1 = vmul.f32 0.02, %v1026_v24 }
 0x25f   :  { %v1115_v63 = vsel %vm1083_vm5, %v1026_v24, %v1099_v1  ;;  %vm1173_vm5 = vcmask 523264   ;;  %v1126_v24 = vld [vmem:[%s2768_s1 + $0x148] sm:$0xff]  ;;  %v1125_v1 = vld [vmem:[%s2768_s1 + $0x140] sm:$0xff] }
 0x260   :  { %v2509_v15 = vpop.f32.mrf.mxu1  ;;  %1190 = vmatpush.msra.mxu2 %v1115_v63  ;;  %1155 = vperm.xlu2 %1709, %v1126_v24   ;;  %v2605_v63 = vld [vmem:[%s2768_s1 + $0x1a0] sm:$0xff] }
 0x261   :  { %v1055_v6 = vadd.f32 %v2509_v15, %v2501_v19  ;;  %v1106_v19 = vsel %vm1074_vm4, %v1052_v60, %v1090_v62  ;;  %1316 = vperm.xlu1 %1711, %v2605_v63   ;;  %v2616_v15 = vld [vmem:[%s2768_s1 + $0x1f0] sm:$0xff]  ;;  %1306 = vperm.xlu0 %1710, %v2644_v18  }
 0x262   :  { %1191 = vmatpush.msra.mxu2 %v1113_v47  ;;  %v1129_v47 = vld [vmem:[%s2768_s1 + $0x160] sm:$0xff] }
 0x263   :  { %v1092_v57 = vmul.f32 0.02, %v1055_v6  ;;  %vm1076_vm3 = vcmp.gt.f32.partialorder %v1055_v6, 0.0 }
 0x264   :  { %1192 = vmatpush.msra.mxu2 %v1111_v39  ;;  %v2657_v39 = vld [vmem:[%s2768_s1 + $0x190] sm:$0xff] }
 0x265   :  { %v1108_v7 = vsel %vm1076_vm3, %v1055_v6, %v1092_v57  ;;  %v1166_v6 = vpop.permute.xlu0 %1165 }
 0x266   :  { %1193 = vmatpush.msra.mxu2 %v1109_v42  ;;  %v2679_v42 = vld [vmem:[%s2768_s1 + $0x210] sm:$0xff] }
 0x268   :  { %v1057_v51 = vpop.f32.mrf.mxu1  ;;  %1194 = vmatpush.msra.mxu2 %v1107_v48  ;;  %1145 = vperm.xlu2 %1709, %v1122_v31   ;;  %v2693_v48 = vld [vmem:[%s2768_s1 + $0x240] sm:$0xff] }
 0x269   :  { %v1058_v55 = vadd.f32 %v1057_v51, %v2496_v20  ;;  %v1121_v20 = vld [vmem:[%s2768_s1 + $0x120] sm:$0xff]  ;;  %1435 = vperm.xlu1 %1711, %v2626_v38   ;;  %v2701_v51 = vld [vmem:[%s2768_s1 + $0x270] sm:$0xff] }
 0x26a   :  { %1195 = vmatpush.msra.mxu2 %v1105_v54 }
 0x26b   :  { %v1094_v16 = vmul.f32 0.02, %v1058_v55  ;;  %vm1078_vm2 = vcmp.gt.f32.partialorder %v1058_v55, 0.0 }
 0x26c   :  { %1196 = vmatpush.msra.mxu2 %v1103_v5  ;;  %v1151_v5 = vpop.permute.xlu1 %1150 }
 0x26e   :  { %1197 = vmatpush.msra.mxu2 %v1101_v56 }
 0x270   :  { %v1060_v49 = vpop.f32.mrf.mxu1  ;;  %1198 = vmatpush.msra.mxu2 %v1713_v45  ;;  %1341 = vperm.xlu2 %1709, %v2616_v15  }
 0x271   :  { %v1061_v2 = vadd.f32 %v1060_v49, %v2494_v12  ;;  %v1110_v12 = vsel %vm1078_vm2, %v1058_v55, %v1094_v16  ;;  %1450 = vperm.xlu1 %1711, %v2649_v36  }
 0x272   :  { %1199 = vmatpush.msra.mxu2 %v1713_v45 }
 0x273   :  { %v1096_v11 = vmul.f32 0.02, %v1061_v2  ;;  %vm1080_vm1 = vcmp.gt.f32.partialorder %v1061_v2, 0.0 }
 0x274   :  { %1200 = vmatpush.msra.mxu2 %v1713_v45  ;;  %v1136_v49 = vpop.permute.xlu1 %1135 }
 0x276   :  { %1201 = vmatpush.msra.mxu2 %v1713_v45 }
 0x278   :  { %v1063_v26 = vpop.f32.mrf.mxu1  ;;  %1202 = vmatpush.msra.mxu2 %v1713_v45  ;;  %1326 = vperm.xlu2 %1709, %v2639_v35  }
 0x279   :  { %v1064_v34 = vadd.f32 %v1063_v26, %v2490_v30  ;;  %v1046_v30 = vadd.f32 %v2486_v14, %v2515_v40  ;;  %v2662_v40 = vld [vmem:[%s2768_s1 + $0x220] sm:$0xff]  ;;  %1465 = vperm.xlu1 %1711, %v2670_v44  }
 0x27a   :  { %1203 = vmatpush.msra.mxu2 %v1713_v45  ;;  %1445 = vperm.xlu0 %1710, %v2662_v40  }
 0x27b   :  { %v1098_v3 = vmul.f32 0.02, %v1064_v34  ;;  %vm1082_vm0 = vcmp.gt.f32.partialorder %v1064_v34, 0.0  ;;  %v1086_v14 = vmul.f32 0.02, %v1046_v30  ;;  %vm1070_vm7 = vcmp.gt.f32.partialorder %v1046_v30, 0.0 }
 0x27c   :  { %1204 = vmatpush.msra.mxu2 %v1713_v45 }
 0x27d   :  { %v1114_v4 = vsel %vm1082_vm0, %v1064_v34, %v1098_v3  ;;  %v1102_v22 = vsel %vm1070_vm7, %v1046_v30, %v1086_v14 }
 0x27e   :  { %1205 = vmatpush.msra.mxu2 %v1713_v45  ;;  %v1119_v45 = vld [vmem:[%s2768_s1 + $0x110] sm:$0xff] }
 0x27f   :  { %1206 = vmatmul.f32.vlgmr.msra.gmra.mxu2 %v1117_v17 }
 0x280   :  { %v1066_v61 = vpop.f32.mrf.mxu1  ;;  %1311 = vperm.xlu2 %1709, %v2657_v39  }
 0x281   :  { %v1067_v25 = vadd.f32 %v1066_v61, %v2488_v50  ;;  %v1112_v50 = vsel %vm1080_vm1, %v1061_v2, %v1096_v11 }
 0x282   :  { %1460 = vperm.xlu0 %1710, %v2684_v46  }
 0x283   :  { %vm1084_vm15 = vcmp.gt.f32.partialorder %v1067_v25, 0.0  ;;  %v1100_v59 = vmul.f32 0.02, %v1067_v25 }
 0x285   :  { %v1116_v13 = vsel %vm1084_vm15, %v1067_v25, %v1100_v59 }
 0x286   :  { %1239 = vmatpush.msra.mxu3 %v1116_v13 }
 0x287   :  { %1209 = vmatmul.f32.gmra.mxu2 %v1119_v45 }
 0x288   :  { %1240 = vmatpush.msra.mxu3 %v1114_v4  ;;  %1440 = vperm.xlu2 %1709, %v2679_v42  }
 0x28a   :  { %1241 = vmatpush.msra.mxu3 %v1112_v50 }
 0x28c   :  { %1242 = vmatpush.msra.mxu3 %v1110_v12 }
 0x28e   :  { %1243 = vmatpush.msra.mxu3 %v1108_v7 }
 0x28f   :  { %1212 = vmatmul.f32.gmra.mxu2 %v1121_v20 }
 0x290   :  { %1244 = vmatpush.msra.mxu3 %v1106_v19  ;;  %1455 = vperm.xlu2 %1709, %v2693_v48  }
 0x292   :  { %1245 = vmatpush.msra.mxu3 %v1104_v21 }
 0x294   :  { %1246 = vmatpush.msra.mxu3 %v1102_v22 }
 0x295   :  { %1676 = vmatmul.msk.f32.vlgmr.msra.gmra.mxu3 %vm1173_vm5, %v1118_v33 }
 0x296   :  { %v1141_v20 = vpop.permute.xlu0 %1140 }
 0x297   :  { %1215 = vmatmul.f32.gmra.mxu2 %v1123_v27 }
 0x298   :  { %1470 = vperm.xlu2 %1709, %v2701_v51  }
 0x29d   :  { %1677 = vmatmul.msk.f32.gmra.mxu3 %vm1173_vm5, %v1120_v43 }
 0x29f   :  { %1218 = vmatmul.f32.gmra.mxu2 %v1125_v1 }
 0x2a5   :  { %1678 = vmatmul.msk.f32.gmra.mxu3 %vm1173_vm5, %v1122_v31 }
 0x2a7   :  { %1221 = vmatmul.f32.gmra.mxu2 %v1127_v9 }
 0x2ac   :  { %v1171_v3 = vpop.permute.xlu2 %1170 }
 0x2ad   :  { %1679 = vmatmul.msk.f32.gmra.mxu3 %vm1173_vm5, %v2532_v29 }
 0x2af   :  { %1224 = vmatmul.f32.gmra.mxu2 %v1129_v47 }
 0x2b5   :  { %1680 = vmatmul.msk.f32.gmra.mxu3 %vm1173_vm5, %v1126_v24 }
 0x2b7   :  { %1227 = vmatmul.f32.gmra.mxu2 %v1131_v41 }
 0x2ba   :  { %v1156_v45 = vpop.permute.xlu2 %1155 }
 0x2bd   :  { %1681 = vmatmul.msk.f32.gmra.mxu3 %vm1173_vm5, %v2523_v53 }
 0x2c2   :  { %v1146_v50 = vpop.permute.xlu2 %1145 }
 0x2c5   :  { %1682 = vmatmul.msk.f32.gmra.mxu3 %vm1173_vm5, %v2543_v23 }
 0x2cd   :  { %1683 = vmatmul.msk.f32.gmra.mxu3 %vm1173_vm5, %v2574_v52 }
 0x302   :  { %v1207_v54 = vpop.f32.mrf.mxu2 }
 0x303   :  { %v1208_v53 = vadd.f32 %v1207_v54, %v1136_v49 }
 0x30a   :  { %v1210_v56 = vpop.f32.mrf.mxu2 }
 0x30b   :  { %v1211_v19 = vadd.f32 %v1210_v56, %v1141_v20 }
 0x312   :  { %v1213_v29 = vpop.f32.mrf.mxu2 }
 0x313   :  { %v1214_v0 = vadd.f32 %v1213_v29, %v1146_v50 }
 0x318   :  { %v1248_v58 = vpop.f32.mrf.mxu3 }
 0x319   :  { %v2706_v26 = vadd.f32 %v1248_v58, %v1208_v53 }
 0x31a   :  { %v1216_v23 = vpop.f32.mrf.mxu2 }
 0x31b   :  { %v1217_v30 = vadd.f32 %v1216_v23, %v1151_v5  ;;  %v1280_v49 = vmul.f32 0.02, %v2706_v26  ;;  %vm1272_vm15 = vcmp.gt.f32.partialorder %v2706_v26, 0.0 }
 0x31d   :  { %v1288_v29 = vsel %vm1272_vm15, %v2706_v26, %v1280_v49 }
 0x320   :  { %v1251_v17 = vpop.f32.mrf.mxu3 }
 0x321   :  { %v1252_v9 = vadd.f32 %v1251_v17, %v1211_v19 }
 0x322   :  { %v1219_v61 = vpop.f32.mrf.mxu2 }
 0x323   :  { %v1220_v16 = vadd.f32 %v1219_v61, %v1156_v45  ;;  %v1281_v5 = vmul.f32 0.02, %v1252_v9  ;;  %vm1273_vm14 = vcmp.gt.f32.partialorder %v1252_v9, 0.0 }
 0x325   :  { %v1289_v58 = vsel %vm1273_vm14, %v1252_v9, %v1281_v5 }
 0x328   :  { %v1254_v34 = vpop.f32.mrf.mxu3 }
 0x329   :  { %v1255_v27 = vadd.f32 %v1254_v34, %v1214_v0  ;;  %v1342_v34 = vpop.permute.xlu2 %1341 }
 0x32a   :  { %v1222_v25 = vpop.f32.mrf.mxu2 }
 0x32b   :  { %v1223_v60 = vadd.f32 %v1222_v25, %v1161_v8  ;;  %v1282_v8 = vmul.f32 0.02, %v1255_v27  ;;  %vm1274_vm13 = vcmp.gt.f32.partialorder %v1255_v27, 0.0 }
 0x32d   :  { %v1290_v53 = vsel %vm1274_vm13, %v1255_v27, %v1282_v8 }
 0x330   :  { %v1257_v2 = vpop.f32.mrf.mxu3 }
 0x331   :  { %v1258_v21 = vadd.f32 %v1257_v2, %v1217_v30  ;;  %v1332_v2 = vpop.permute.xlu1 %1331 }
 0x332   :  { %v1225_v33 = vpop.f32.mrf.mxu2 }
 0x333   :  { %v1226_v13 = vadd.f32 %v1225_v33, %v1166_v6  ;;  %v1283_v47 = vmul.f32 0.02, %v1258_v21  ;;  %vm1275_vm12 = vcmp.gt.f32.partialorder %v1258_v21, 0.0 }
 0x335   :  { %v1291_v56 = vsel %vm1275_vm12, %v1258_v21, %v1283_v47 }
 0x338   :  { %v1260_v55 = vpop.f32.mrf.mxu3 }
 0x339   :  { %v1261_v7 = vadd.f32 %v1260_v55, %v1220_v16 }
 0x33a   :  { %v1228_v43 = vpop.f32.mrf.mxu2 }
 0x33b   :  { %v1229_v4 = vadd.f32 %v1228_v43, %v1171_v3  ;;  %v1284_v1 = vmul.f32 0.02, %v1261_v7  ;;  %vm1276_vm11 = vcmp.gt.f32.partialorder %v1261_v7, 0.0 }
 0x33d   :  { %v1292_v54 = vsel %vm1276_vm11, %v1261_v7, %v1284_v1 }
 0x340   :  { %v1263_v59 = vpop.f32.mrf.mxu3 }
 0x341   :  { %v1264_v62 = vadd.f32 %v1263_v59, %v1223_v60 }
 0x343   :  { %v1285_v22 = vmul.f32 0.02, %v1264_v62  ;;  %vm1277_vm10 = vcmp.gt.f32.partialorder %v1264_v62, 0.0 }
 0x345   :  { %v1293_v41 = vsel %vm1277_vm10, %v1264_v62, %v1285_v22 }
 0x348   :  { %v1266_v11 = vpop.f32.mrf.mxu3 }
 0x349   :  { %v1267_v10 = vadd.f32 %v1266_v11, %v1226_v13  ;;  %v1317_v13 = vpop.permute.xlu1 %1316 }
 0x34b   :  { %v1286_v52 = vmul.f32 0.02, %v1267_v10  ;;  %vm1278_vm9 = vcmp.gt.f32.partialorder %v1267_v10, 0.0 }
 0x34d   :  { %v1294_v31 = vsel %vm1278_vm9, %v1267_v10, %v1286_v52 }
 0x350   :  { %v1269_v57 = vpop.f32.mrf.mxu3 }
 0x351   :  { %v1270_v12 = vadd.f32 %v1269_v57, %v1229_v4 }
 0x353   :  { %vm1279_vm8 = vcmp.gt.f32.partialorder %v1270_v12, 0.0  ;;  %v1287_v14 = vmul.f32 0.02, %v1270_v12 }
 0x355   :  { %v1295_v24 = vsel %vm1279_vm8, %v1270_v12, %v1287_v14 }
 0x356   :  { %1368 = vmatpush.msrb.mxu0 %v1295_v24 }
 0x358   :  { %1369 = vmatpush.msrb.mxu0 %v1294_v31 }
 0x35a   :  { %1370 = vmatpush.msrb.mxu0 %v1293_v41 }
 0x35c   :  { %1371 = vmatpush.msrb.mxu0 %v1292_v54 }
 0x35e   :  { %1372 = vmatpush.msrb.mxu0 %v1291_v56 }
 0x360   :  { %1373 = vmatpush.msrb.mxu0 %v1290_v53 }
 0x362   :  { %1374 = vmatpush.msrb.mxu0 %v1289_v58 }
 0x364   :  { %1375 = vmatpush.msrb.mxu0 %v1288_v29 }
 0x365   :  { %1684 = vmatmul.msk.f32.vlgmr.msrb.gmra.mxu0 %vm1173_vm5, %v2644_v18 }
 0x36d   :  { %1685 = vmatmul.msk.f32.gmra.mxu0 %vm1173_vm5, %v2657_v39 }
 0x375   :  { %1686 = vmatmul.msk.f32.gmra.mxu0 %vm1173_vm5, %v2605_v63 }
 0x37d   :  { %1687 = vmatmul.msk.f32.gmra.mxu0 %vm1173_vm5, %v2621_v37  ;;  %v1337_v37 = vpop.permute.xlu0 %1336 }
 0x385   :  { %1688 = vmatmul.msk.f32.gmra.mxu0 %vm1173_vm5, %v2639_v35  ;;  %v1327_v35 = vpop.permute.xlu2 %1326  ;;  %v1322_v55 = vpop.permute.xlu0 %1321 }
 0x38d   :  { %1689 = vmatmul.msk.f32.gmra.mxu0 %vm1173_vm5, %v2587_v28  ;;  %v1312_v4 = vpop.permute.xlu2 %1311  ;;  %v1307_v30 = vpop.permute.xlu0 %1306 }
 0x395   :  { %1690 = vmatmul.msk.f32.gmra.mxu0 %vm1173_vm5, %v2600_v32 }
 0x39d   :  { %1691 = vmatmul.msk.f32.gmra.mxu0 %vm1173_vm5, %v2616_v15 }
 0x3e2   :  { %v1377_v18 = vpop.f32.mrf.mxu0 }
 0x3e3   :  { %v1378_v62 = vadd.f32 %v1377_v18, %v1307_v30 }
 0x3e5   :  { %v1409_v52 = vmul.f32 0.02, %v1378_v62  ;;  %vm1401_vm8 = vcmp.gt.f32.partialorder %v1378_v62, 0.0 }
 0x3e7   :  { %v1417_v21 = vsel %vm1401_vm8, %v1378_v62, %v1409_v52 }
 0x3ea   :  { %v1380_v39 = vpop.f32.mrf.mxu0 }
 0x3eb   :  { %v1381_v10 = vadd.f32 %v1380_v39, %v1312_v4 }
 0x3ed   :  { %v1410_v0 = vmul.f32 0.02, %v1381_v10  ;;  %vm1402_vm7 = vcmp.gt.f32.partialorder %v1381_v10, 0.0 }
 0x3ef   :  { %v1418_v19 = vsel %vm1402_vm7, %v1381_v10, %v1410_v0 }
 0x3f2   :  { %v1383_v26 = vpop.f32.mrf.mxu0 }
 0x3f3   :  { %v1384_v43 = vadd.f32 %v1383_v26, %v1317_v13 }
 0x3f5   :  { %v1411_v12 = vmul.f32 0.02, %v1384_v43  ;;  %vm1403_vm6 = vcmp.gt.f32.partialorder %v1384_v43, 0.0 }
 0x3f7   :  { %v1419_v14 = vsel %vm1403_vm6, %v1384_v43, %v1411_v12 }
 0x3fa   :  { %v1386_v17 = vpop.f32.mrf.mxu0 }
 0x3fb   :  { %v1387_v45 = vadd.f32 %v1386_v17, %v1322_v55 }
 0x3fd   :  { %v1412_v57 = vmul.f32 0.02, %v1387_v45  ;;  %vm1404_vm4 = vcmp.gt.f32.partialorder %v1387_v45, 0.0 }
 0x3ff   :  { %v1420_v7 = vsel %vm1404_vm4, %v1387_v45, %v1412_v57 }
 0x402   :  { %v1389_v63 = vpop.f32.mrf.mxu0 }
 0x403   :  { %v1390_v32 = vadd.f32 %v1389_v63, %v1327_v35 }
 0x405   :  { %v1413_v60 = vmul.f32 0.02, %v1390_v32  ;;  %vm1405_vm3 = vcmp.gt.f32.partialorder %v1390_v32, 0.0 }
 0x407   :  { %v1421_v20 = vsel %vm1405_vm3, %v1390_v32, %v1413_v60 }
 0x40a   :  { %v1392_v23 = vpop.f32.mrf.mxu0 }
 0x40b   :  { %v1393_v3 = vadd.f32 %v1392_v23, %v1332_v2 }
 0x40d   :  { %v1414_v6 = vmul.f32 0.02, %v1393_v3  ;;  %vm1406_vm2 = vcmp.gt.f32.partialorder %v1393_v3, 0.0 }
 0x40f   :  { %v1422_v50 = vsel %vm1406_vm2, %v1393_v3, %v1414_v6 }
 0x412   :  { %v1395_v61 = vpop.f32.mrf.mxu0 }
 0x413   :  { %v1396_v25 = vadd.f32 %v1395_v61, %v1337_v37 }
 0x415   :  { %v1415_v33 = vmul.f32 0.02, %v1396_v25  ;;  %vm1407_vm1 = vcmp.gt.f32.partialorder %v1396_v25, 0.0 }
 0x417   :  { %v1423_v16 = vsel %vm1407_vm1, %v1396_v25, %v1415_v33 }
 0x41a   :  { %v1398_v28 = vpop.f32.mrf.mxu0 }
 0x41b   :  { %v1399_v59 = vadd.f32 %v1398_v28, %v1342_v34 }
 0x41d   :  { %vm1408_vm0 = vcmp.gt.f32.partialorder %v1399_v59, 0.0  ;;  %v1416_v15 = vmul.f32 0.02, %v1399_v59 }
 0x41f   :  { %v1424_v11 = vsel %vm1408_vm0, %v1399_v59, %v1416_v15 }
 0x420   :  { %1497 = vmatpush.msrb.mxu1 %v1424_v11 }
 0x422   :  { %1498 = vmatpush.msrb.mxu1 %v1423_v16 }
 0x424   :  { %1499 = vmatpush.msrb.mxu1 %v1422_v50 }
 0x426   :  { %1500 = vmatpush.msrb.mxu1 %v1421_v20 }
 0x428   :  { %1501 = vmatpush.msrb.mxu1 %v1420_v7 }
 0x42a   :  { %1502 = vmatpush.msrb.mxu1 %v1419_v14 }
 0x42c   :  { %1503 = vmatpush.msrb.mxu1 %v1418_v19 }
 0x42e   :  { %1504 = vmatpush.msrb.mxu1 %v1417_v21 }
 0x42f   :  { %1692 = vmatmul.msk.f32.vlgmr.msrb.gmra.mxu1 %vm1173_vm5, %v2626_v38  ;;  %v1436_v38 = vpop.permute.xlu1 %1435 }
 0x437   :  { %1693 = vmatmul.msk.f32.gmra.mxu1 %vm1173_vm5, %v2679_v42 }
 0x43f   :  { %1694 = vmatmul.msk.f32.gmra.mxu1 %vm1173_vm5, %v2662_v40 }
 0x447   :  { %1695 = vmatmul.msk.f32.gmra.mxu1 %vm1173_vm5, %v2649_v36  ;;  %v1441_v36 = vpop.permute.xlu2 %1440 }
 0x44f   :  { %1696 = vmatmul.msk.f32.gmra.mxu1 %vm1173_vm5, %v2693_v48  ;;  %v1456_v31 = vpop.permute.xlu2 %1455 }
 0x457   :  { %1697 = vmatmul.msk.f32.gmra.mxu1 %vm1173_vm5, %v2684_v46  ;;  %v1446_v46 = vpop.permute.xlu0 %1445  ;;  %v1471_v53 = vpop.permute.xlu2 %1470 }
 0x45f   :  { %1698 = vmatmul.msk.f32.gmra.mxu1 %vm1173_vm5, %v2670_v44  ;;  %v1461_v41 = vpop.permute.xlu0 %1460 }
 0x467   :  { %1699 = vmatmul.msk.f32.gmra.mxu1 %vm1173_vm5, %v2701_v51  ;;  %v1451_v51 = vpop.permute.xlu1 %1450 }
 0x46f   :  { %v1466_v5 = vpop.permute.xlu1 %1465 }
 0x4ac   :  { %v1506_v42 = vpop.f32.mrf.mxu1 }
 0x4ad   :  { %v1507_v22 = vadd.f32 %v1506_v42, %v1436_v38 }
 0x4af   :  { %1530 = vst [vmem:[%s2769_s2] sm:$0xff] %v1507_v22 }
 0x4b4   :  { %v1509_v40 = vpop.f32.mrf.mxu1 }
 0x4b5   :  { %v1510_v24 = vadd.f32 %v1509_v40, %v1441_v36 }
 0x4b7   :  { %1531 = vst [vmem:[%s2769_s2 + $0x8] sm:$0xff] %v1510_v24 }
 0x4bc   :  { %v1512_v48 = vpop.f32.mrf.mxu1 }
 0x4bd   :  { %v1513_v44 = vadd.f32 %v1512_v48, %v1446_v46 }
 0x4bf   :  { %1532 = vst [vmem:[%s2769_s2 + $0x10] sm:$0xff] %v1513_v44 }
 0x4c4   :  { %v1515_v27 = vpop.f32.mrf.mxu1 }
 0x4c5   :  { %v1516_v1 = vadd.f32 %v1515_v27, %v1451_v51 }
 0x4c7   :  { %1533 = vst [vmem:[%s2769_s2 + $0x18] sm:$0xff] %v1516_v1 }
 0x4cc   :  { %v1518_v9 = vpop.f32.mrf.mxu1 }
 0x4cd   :  { %v1519_v47 = vadd.f32 %v1518_v9, %v1456_v31 }
 0x4cf   :  { %1534 = vst [vmem:[%s2769_s2 + $0x20] sm:$0xff] %v1519_v47 }
 0x4d4   :  { %v1521_v8 = vpop.f32.mrf.mxu1 }
 0x4d5   :  { %v1522_v54 = vadd.f32 %v1521_v8, %v1461_v41 }
 0x4d7   :  { %1535 = vst [vmem:[%s2769_s2 + $0x28] sm:$0xff] %v1522_v54 }
 0x4dc   :  { %v1524_v56 = vpop.f32.mrf.mxu1 }
 0x4dd   :  { %v1525_v49 = vadd.f32 %v1524_v56, %v1466_v5 }
 0x4df   :  { %1536 = vst [vmem:[%s2769_s2 + $0x30] sm:$0xff] %v1525_v49 }
 0x4e4   :  { %v1527_v58 = vpop.f32.mrf.mxu1 }
 0x4e5   :  { %v1528_v29 = vadd.f32 %v1527_v58, %v1471_v53 }
 0x4e7   :  { %1537 = vst [vmem:[%s2769_s2 + $0x38] sm:$0xff] %v1528_v29 }

</bundles_post_ra>
